<compile_context>
chip_gen: v7x
topology: tpu7x:2x2x1
jax: 0.10.0
libtpu: 0.0.40
codegen_flags: <defaults>
</compile_context>

<pallas_src>
import jax
import jax.numpy as jnp
from jax import lax
from jax.experimental import pallas as pl
from jax.experimental.pallas import tpu as pltpu

# Hyperparameters implied by the module (fc expects c*2*7*7 -> input is 1x28x28).
CAPACITY = 4        # `capacity` global in the original script (kept small)
LATENT_DIMS = 16    # `latent_dims` global in the original script (kept small)


def _round_up(x, m):
    return (x + m - 1) // m * m


def _cdiv(a, b):
    return -(-a // b)


# ----------------------------------------------------------------------------
# Pallas kernel: the whole encoder forward for one tile of batch rows.
#   x_ref   : (tm, Cin*H*W)   f32   flattened input rows (C,H,W order)
#   m1_ref  : (Cin*H*W, c*14*14)  bf16  conv1 lowered to a dense GEMM matrix
#   m2_ref  : (c*14*14, 2c*7*7)   bf16  conv2 lowered to a dense GEMM matrix
#   wfc_ref : (2c*7*7, 128)       bf16  fc weight, pre-transposed, lane-padded
#   biases  : (1, width)          f32   broadcast over rows
# All matmuls run bf16 x bf16 -> f32 accumulation on the MXU; the elementwise
# epilogues (bias + ReLU) stay in f32.
# ----------------------------------------------------------------------------
def _encoder_kernel(x_ref, m1_ref, b1_ref, m2_ref, b2_ref, wfc_ref, bfc_ref,
                    o_ref):
    # conv1 (as GEMM) + bias + ReLU
    h = jnp.dot(x_ref[...].astype(jnp.bfloat16), m1_ref[...],
                preferred_element_type=jnp.float32)
    h = jnp.maximum(h + b1_ref[...], 0.0)
    # conv2 (as GEMM) + bias + ReLU
    h = jnp.dot(h.astype(jnp.bfloat16), m2_ref[...],
                preferred_element_type=jnp.float32)
    h = jnp.maximum(h + b2_ref[...], 0.0)
    # fc (epilogue folded into the same kernel, 128-lane padded output)
    out = jnp.dot(h.astype(jnp.bfloat16), wfc_ref[...],
                  preferred_element_type=jnp.float32)
    o_ref[...] = (out + bfc_ref[...]).astype(o_ref.dtype)


# ----------------------------------------------------------------------------
# One-time weight transform: lower a PyTorch Conv2d to a dense GEMM matrix.
# With (C, H, W)-order flattening:   conv(x)_flat == x_flat @ M   (+ bias).
# ----------------------------------------------------------------------------
def _conv_as_matrix(w, cin, h_in, w_in, stride, pad):
    cout, cin_w, kh, kw = w.shape
    assert cin_w == cin
    oh = (h_in + 2 * pad - kh) // stride + 1
    ow = (w_in + 2 * pad - kw) // stride + 1
    co, ci, ki, kj, po, qo = jnp.meshgrid(
        jnp.arange(cout), jnp.arange(cin), jnp.arange(kh), jnp.arange(kw),
        jnp.arange(oh), jnp.arange(ow), indexing="ij")
    i = stride * po - pad + ki                    # input row used by (oh, ki)
    j = stride * qo - pad + kj                    # input col used by (ow, kj)
    valid = (i >= 0) & (i < h_in) & (j >= 0) & (j < w_in)
    row = ci * (h_in * w_in) + jnp.clip(i, 0, h_in - 1) * w_in \
        + jnp.clip(j, 0, w_in - 1)
    col = co * (oh * ow) + po * ow + qo
    vals = w[co, ci, ki, kj] * valid.astype(w.dtype)   # padding -> contributes 0
    mat = jnp.zeros((cin * h_in * w_in, cout * oh * ow), w.dtype)
    mat = mat.at[row.ravel(), col.ravel()].add(vals.ravel())
    return mat, oh, ow


def prepare_params(params):
    """One-time transform of PyTorch-layout params into kernel operands."""
    c = params["conv1_w"].shape[0]
    m1, oh1, ow1 = _conv_as_matrix(params["conv1_w"], 1, 28, 28, stride=2, pad=1)
    m2, oh2, ow2 = _conv_as_matrix(params["conv2_w"], c, oh1, ow1, stride=2, pad=1)

    wfc = params["fc_w"].T                               # (2c*49, latent)
    d_fc, latent = wfc.shape
    lat_pad = _round_up(latent, 128)                     # lane-dense output
    wfc_p = jnp.zeros((d_fc, lat_pad), jnp.float32).at[:, :latent].set(wfc)
    bfc_p = jnp.zeros((lat_pad,), jnp.float32).at[:latent].set(params["fc_b"])

    return {
        # bf16 MXU operands (cast once, here — never in the hot path)
        "m1": m1.astype(jnp.bfloat16),                   # (784, c*196)
        "m2": m2.astype(jnp.bfloat16),                   # (c*196, 2c*49)
        "wfc": wfc_p.astype(jnp.bfloat16),               # (2c*49, 128)
        # f32 biases (elementwise epilogue stays f32)
        "b1": jnp.repeat(params["conv1_b"], oh1 * ow1)[None, :].astype(jnp.float32),
        "b2": jnp.repeat(params["conv2_b"], oh2 * ow2)[None, :].astype(jnp.float32),
        "bfc": bfc_p[None, :],                           # (1, 128)
    }


def _choose_tile(n, max_tm=512):
    """Balanced M tiles: <=max_tm rows, >=2 grid steps when the batch allows
    (so v7x's second TensorCore gets work), minimal padding waste."""
    n_tiles = max(1, _cdiv(n, max_tm))
    if n >= 16 and n_tiles < 2:
        n_tiles = 2
    tm = _round_up(_cdiv(n, n_tiles), 8)                 # sublane alignment
    return tm, tm * n_tiles


# ----------------------------------------------------------------------------
# Encoder forward: one fused pallas_call, batch rows tiled on a parallel grid.
# ----------------------------------------------------------------------------
def encoder_forward(prep, x, latent_dims=LATENT_DIMS):
    n = x.shape[0]
    k1, d1 = prep["m1"].shape
    d2 = prep["m2"].shape[1]
    dl = prep["wfc"].shape[1]                            # 128 (lane-padded)

    x_flat = x.reshape(n, -1).astype(jnp.float32)   # (N, Cin*H*W) == torch .view
    assert x_flat.shape[1] == k1

    tm, n_pad = _choose_tile(n)
    if n_pad != n:
        x_flat = jnp.pad(x_flat, ((0, n_pad - n), (0, 0)))

    out = pl.pallas_call(
        _encoder_kernel,
        out_shape=jax.ShapeDtypeStruct((n_pad, dl), jnp.float32),
        grid_spec=pltpu.PrefetchScalarGridSpec(
            num_scalar_prefetch=0,
            grid=(n_pad // tm,),
            in_specs=[
                pl.BlockSpec((tm, k1), lambda m: (m, 0)),    # x row tile
                pl.BlockSpec((k1, d1), lambda m: (0, 0)),    # conv1 GEMM (resident)
                pl.BlockSpec((1, d1), lambda m: (0, 0)),     # conv1 bias
                pl.BlockSpec((d1, d2), lambda m: (0, 0)),    # conv2 GEMM (resident)
                pl.BlockSpec((1, d2), lambda m: (0, 0)),     # conv2 bias
                pl.BlockSpec((d2, dl), lambda m: (0, 0)),    # fc weight (pre-T, padded)
                pl.BlockSpec((1, dl), lambda m: (0, 0)),     # fc bias (padded)
            ],
            out_specs=pl.BlockSpec((tm, dl), lambda m: (m, 0)),  # lane-dense store
        ),
        compiler_params=pltpu.CompilerParams(
            dimension_semantics=("parallel",),   # M tiles independent (2 TCs on v7x)
            vmem_limit_bytes=48 * 1024 * 1024,   # headroom for tm up to 512 everywhere
        ),
    )(x_flat, prep["m1"], prep["b1"], prep["m2"], prep["b2"],
      prep["wfc"], prep["bfc"])
    return out[:n, :latent_dims]


# ----------------------------------------------------------------------------
# Params / reference / driver
# ----------------------------------------------------------------------------
def init_params(key):
    c = CAPACITY
    k1, k2, k3, k4, k5, k6 = jax.random.split(key, 6)
    return {
        "conv1_w": 0.1 * jax.random.normal(k1, (c, 1, 4, 4), jnp.float32),
        "conv1_b": 0.1 * jax.random.normal(k2, (c,), jnp.float32),
        "conv2_w": 0.1 * jax.random.normal(k3, (c * 2, c, 4, 4), jnp.float32),
        "conv2_b": 0.1 * jax.random.normal(k4, (c * 2,), jnp.float32),
        "fc_w": 0.05 * jax.random.normal(k5, (LATENT_DIMS, c * 2 * 7 * 7), jnp.float32),
        "fc_b": 0.05 * jax.random.normal(k6, (LATENT_DIMS,), jnp.float32),
    }


def encoder_reference(params, x):
    """Plain-JAX reference with PyTorch semantics (for verification only)."""
    dn = ("NCHW", "OIHW", "NCHW")
    y = lax.conv_general_dilated(x, params["conv1_w"], (2, 2),
                                 ((1, 1), (1, 1)), dimension_numbers=dn)
    y = jax.nn.relu(y + params["conv1_b"][None, :, None, None])
    y = lax.conv_general_dilated(y, params["conv2_w"], (2, 2),
                                 ((1, 1), (1, 1)), dimension_numbers=dn)
    y = jax.nn.relu(y + params["conv2_b"][None, :, None, None])
    y = y.reshape(y.shape[0], -1)
    return y @ params["fc_w"].T + params["fc_b"]


if __name__ == "__main__":
    key = jax.random.PRNGKey(0)
    pkey, xkey = jax.random.split(key)
    params = init_params(pkey)
    prep = prepare_params(params)    # one-time weight transform, not in hot path

    # MNIST-style input (fc's 2c*7*7 implies 28x28, Cin=1), small batch.
    x = jax.random.normal(xkey, (2, 1, 28, 28), jnp.float32)

    out = jax.jit(encoder_forward)(prep, x)
    out = jax.block_until_ready(out)

    assert out.shape == (2, LATENT_DIMS), out.shape
    assert bool(jnp.all(jnp.isfinite(out)))

    ref = encoder_reference(params, x)
    assert jnp.allclose(out, ref, atol=2e-2, rtol=2e-2), \
        float(jnp.max(jnp.abs(out - ref)))

    print("KERNEL_OK")
</pallas_src>

<mosaic_0001>
module attributes {stable_mosaic.version = 11 : i64} {
  func.func @_encoder_kernel(%arg0: i32, %arg1: memref<8x784xf32, #tpu.memory_space<vmem>>, %arg2: memref<784x784xbf16, #tpu.memory_space<vmem>>, %arg3: memref<1x784xf32, #tpu.memory_space<vmem>>, %arg4: memref<784x392xbf16, #tpu.memory_space<vmem>>, %arg5: memref<1x392xf32, #tpu.memory_space<vmem>>, %arg6: memref<392x128xbf16, #tpu.memory_space<vmem>>, %arg7: memref<1x128xf32, #tpu.memory_space<vmem>>, %arg8: memref<8x128xf32, #tpu.memory_space<vmem>>) attributes {dimension_semantics = [#tpu.dimension_semantics<parallel>], iteration_bounds = array<i64: 1>, scalar_prefetch = 0 : i64, scratch_operands = 0 : i64, tpu.core_type = #tpu.core_type<tc>, window_params = [{transform_indices = @transform_0, window_bounds = array<i64: 8, 784>}, {pipeline_mode = #tpu.pipeline_mode<synchronous>, transform_indices = @transform_1, window_bounds = array<i64: 784, 784>}, {pipeline_mode = #tpu.pipeline_mode<synchronous>, transform_indices = @transform_2, window_bounds = array<i64: 1, 784>}, {pipeline_mode = #tpu.pipeline_mode<synchronous>, transform_indices = @transform_3, window_bounds = array<i64: 784, 392>}, {pipeline_mode = #tpu.pipeline_mode<synchronous>, transform_indices = @transform_4, window_bounds = array<i64: 1, 392>}, {pipeline_mode = #tpu.pipeline_mode<synchronous>, transform_indices = @transform_5, window_bounds = array<i64: 392, 128>}, {pipeline_mode = #tpu.pipeline_mode<synchronous>, transform_indices = @transform_6, window_bounds = array<i64: 1, 128>}, {transform_indices = @transform_7, window_bounds = array<i64: 8, 128>}]} {
    %c0 = arith.constant 0 : index
    %c0_0 = arith.constant 0 : index
    %0 = vector.load %arg1[%c0, %c0_0] : memref<8x784xf32, #tpu.memory_space<vmem>>, vector<8x784xf32>
    %1 = arith.truncf %0 : vector<8x784xf32> to vector<8x784xbf16>
    %c0_1 = arith.constant 0 : index
    %c0_2 = arith.constant 0 : index
    %2 = vector.load %arg2[%c0_1, %c0_2] : memref<784x784xbf16, #tpu.memory_space<vmem>>, vector<784x784xbf16>
    %cst = arith.constant dense<0.000000e+00> : vector<8x784xf32>
    %3 = tpu.matmul %1, %2, %cst {dimension_numbers = #tpu.dot_dimension_numbers<[1], [0], [0], [1], [0, 0, 1, 1], [], []>} : vector<8x784xbf16>, vector<784x784xbf16>, vector<8x784xf32> -> vector<8x784xf32>
    %c0_3 = arith.constant 0 : index
    %c0_4 = arith.constant 0 : index
    %4 = vector.load %arg3[%c0_3, %c0_4] : memref<1x784xf32, #tpu.memory_space<vmem>>, vector<1x784xf32>
    %5 = vector.broadcast %4 : vector<1x784xf32> to vector<8x784xf32>
    %6 = arith.addf %3, %5 : vector<8x784xf32>
    %cst_5 = arith.constant 0.000000e+00 : f32
    %7 = vector.broadcast %cst_5 : f32 to vector<8x784xf32>
    %8 = arith.maximumf %6, %7 : vector<8x784xf32>
    %9 = arith.truncf %8 : vector<8x784xf32> to vector<8x784xbf16>
    %c0_6 = arith.constant 0 : index
    %c0_7 = arith.constant 0 : index
    %10 = vector.load %arg4[%c0_6, %c0_7] : memref<784x392xbf16, #tpu.memory_space<vmem>>, vector<784x392xbf16>
    %cst_8 = arith.constant dense<0.000000e+00> : vector<8x392xf32>
    %11 = tpu.matmul %9, %10, %cst_8 {dimension_numbers = #tpu.dot_dimension_numbers<[1], [0], [0], [1], [0, 0, 1, 1], [], []>} : vector<8x784xbf16>, vector<784x392xbf16>, vector<8x392xf32> -> vector<8x392xf32>
    %c0_9 = arith.constant 0 : index
    %c0_10 = arith.constant 0 : index
    %12 = vector.load %arg5[%c0_9, %c0_10] : memref<1x392xf32, #tpu.memory_space<vmem>>, vector<1x392xf32>
    %13 = vector.broadcast %12 : vector<1x392xf32> to vector<8x392xf32>
    %14 = arith.addf %11, %13 : vector<8x392xf32>
    %cst_11 = arith.constant 0.000000e+00 : f32
    %15 = vector.broadcast %cst_11 : f32 to vector<8x392xf32>
    %16 = arith.maximumf %14, %15 : vector<8x392xf32>
    %17 = arith.truncf %16 : vector<8x392xf32> to vector<8x392xbf16>
    %c0_12 = arith.constant 0 : index
    %c0_13 = arith.constant 0 : index
    %18 = vector.load %arg6[%c0_12, %c0_13] : memref<392x128xbf16, #tpu.memory_space<vmem>>, vector<392x128xbf16>
    %cst_14 = arith.constant dense<0.000000e+00> : vector<8x128xf32>
    %19 = tpu.matmul %17, %18, %cst_14 {dimension_numbers = #tpu.dot_dimension_numbers<[1], [0], [0], [1], [0, 0, 1, 1], [], []>} : vector<8x392xbf16>, vector<392x128xbf16>, vector<8x128xf32> -> vector<8x128xf32>
    %c0_15 = arith.constant 0 : index
    %c0_16 = arith.constant 0 : index
    %20 = vector.load %arg7[%c0_15, %c0_16] : memref<1x128xf32, #tpu.memory_space<vmem>>, vector<1x128xf32>
    %21 = vector.broadcast %20 : vector<1x128xf32> to vector<8x128xf32>
    %22 = arith.addf %19, %21 : vector<8x128xf32>
    %c0_17 = arith.constant 0 : index
    %c0_18 = arith.constant 0 : index
    %23 = vector.load %arg8[%c0_17, %c0_18] : memref<8x128xf32, #tpu.memory_space<vmem>>, vector<8x128xf32>
    tpu.vector_store %arg8[%c0_17, %c0_18], %22 {strides = array<i32>} : memref<8x128xf32, #tpu.memory_space<vmem>>, vector<8x128xf32>,
    return
  }
  func.func @transform_0(%arg0: i32) -> (i32, i32) {
    %c0_i32 = arith.constant 0 : i32
    %c0_i32_0 = arith.constant 0 : i32
    return %arg0, %c0_i32 : i32, i32
  }
  func.func @transform_1(%arg0: i32) -> (i32, i32) {
    %c0_i32 = arith.constant 0 : i32
    %c0_i32_0 = arith.constant 0 : i32
    %c0_i32_1 = arith.constant 0 : i32
    return %c0_i32, %c0_i32_0 : i32, i32
  }
  func.func @transform_2(%arg0: i32) -> (i32, i32) {
    %c0_i32 = arith.constant 0 : i32
    %c0_i32_0 = arith.constant 0 : i32
    %c0_i32_1 = arith.constant 0 : i32
    return %c0_i32, %c0_i32_0 : i32, i32
  }
  func.func @transform_3(%arg0: i32) -> (i32, i32) {
    %c0_i32 = arith.constant 0 : i32
    %c0_i32_0 = arith.constant 0 : i32
    %c0_i32_1 = arith.constant 0 : i32
    return %c0_i32, %c0_i32_0 : i32, i32
  }
  func.func @transform_4(%arg0: i32) -> (i32, i32) {
    %c0_i32 = arith.constant 0 : i32
    %c0_i32_0 = arith.constant 0 : i32
    %c0_i32_1 = arith.constant 0 : i32
    return %c0_i32, %c0_i32_0 : i32, i32
  }
  func.func @transform_5(%arg0: i32) -> (i32, i32) {
    %c0_i32 = arith.constant 0 : i32
    %c0_i32_0 = arith.constant 0 : i32
    %c0_i32_1 = arith.constant 0 : i32
    return %c0_i32, %c0_i32_0 : i32, i32
  }
  func.func @transform_6(%arg0: i32) -> (i32, i32) {
    %c0_i32 = arith.constant 0 : i32
    %c0_i32_0 = arith.constant 0 : i32
    %c0_i32_1 = arith.constant 0 : i32
    return %c0_i32, %c0_i32_0 : i32, i32
  }
  func.func @transform_7(%arg0: i32) -> (i32, i32) {
    %c0_i32 = arith.constant 0 : i32
    %c0_i32_0 = arith.constant 0 : i32
    return %arg0, %c0_i32 : i32, i32
  }
}

</mosaic_0001>

<bundles_post_ra>
// kernel: encoder_forward.1
= control target key start
LH: loop header
LB: loop body
LE: loop exit
PB: predicated region body
PF: predicated region fallthrough
CT: control target
= control target key end

     0   :  { %v6283_v1 = vmov 0   ;;  %vm2234_vm0 = vcmask 130048   ;;  %vm6285_vm1 = vmmov 0   ;;  %vm4644_vm2 = vcmask 64512   ;;  %s8179_s1 = inlined_call_operand.vmem [shape: bf16[784,784], index: 1, kind: input, shape index: {}]   ;;  %s8180_s0 = inlined_call_operand.vmem [shape: f32[8,784], index: 0, kind: input, shape index: {}]   ;;  %s8181_s3 = inlined_call_operand.vmem [shape: bf16[784,392], index: 3, kind: input, shape index: {}]   ;;  %s8182_s2 = inlined_call_operand.vmem [shape: f32[1,784], index: 2, kind: input, shape index: {}]   ;;  %s8183_s5 = inlined_call_operand.vmem [shape: bf16[392,128], index: 5, kind: input, shape index: {}]   ;;  %s8184_s4 = inlined_call_operand.vmem [shape: f32[1,392], index: 4, kind: input, shape index: {}]   ;;  %s8185_s6 = inlined_call_operand.vmem [shape: f32[1,128], index: 6, kind: input, shape index: {}]   ;;  %s8186_s7 = inlined_call_operand.vmem [shape: f32[8,128], index: 7, kind: output, shape index: {}]  }
   0x1   :  { %v5474_v0 = vld [vmem:[%s8179_s1 + $0x4] ss:$28 sps:$4 sm:$0xff]   ;;  %2393 = vmatprep.mubr.bf16.mxu1 %v6283_v1  ;;  %v5480_v5 = vld [vmem:[%s8179_s1 + $0x3c] ss:$28 sps:$4 sm:$0xff]   ;;  %v5484_v7 = vld [vmem:[%s8179_s1 + $0xc] ss:$28 sps:$4 sm:$0xff]  }
   0x2   :  { %v5476_v2 = vld [vmem:[%s8179_s1 + $0xa84] ss:$28 sps:$4 sm:$0xff]   ;;  %2238 = vmatprep.subr.bf16.mxu0 %v5474_v0  ;;  %v5485_v8 = vld [vmem:[%s8179_s1 + $0x38] ss:$28 sps:$4 sm:$0xff]   ;;  %v5491_v14 = vld [vmem:[%s8179_s1 + $0x70] ss:$28 sps:$4 sm:$0xff]  }
   0x3   :  { %v5478_v3 = vld [vmem:[%s8179_s1] ss:$28 sps:$4 sm:$0xff]   ;;  %2361 = vmatprep.subr.bf16.mxu1 %v5476_v2  ;;  %v5482_v6 = vld [vmem:[%s8179_s1 + $0x8] ss:$28 sps:$4 sm:$0xff]   ;;  %v33_v9 = vld [vmem:[%s8180_s0 + $0x30] sm:$0xff]  ;;  %vm4648_vm3 = vcmask 1043456  }
   0x4   :  { %v5479_v4 = vld [vmem:[%s8179_s1 + $0xa80] ss:$28 sps:$4 sm:$0xff]   ;;  %2239 = vmatpush1.bf16.msra.mxu0 %v5478_v3  ;;  %v6354_v10 = vpack.c.bf16 %v33_v9, %v33_v9  ;;  %v5486_v11 = vld [vmem:[%s8179_s1 + $0x74] ss:$28 sps:$4 sm:$0xff]   ;;  %v5492_v15 = vld [vmem:[%s8179_s1 + $0xac] ss:$28 sps:$4 sm:$0xff]  }
   0x5   :  { %2362 = vmatpush1.bf16.msra.mxu1 %v5479_v4  ;;  %2240 = vmatprep.subr.bf16.mxu0 %v5480_v5  ;;  %v5488_v12 = vld [vmem:[%s8179_s1 + $0x40] ss:$28 sps:$4 sm:$0xff]   ;;  %v5497_v17 = vld [vmem:[%s8179_s1 + $0xa8] ss:$28 sps:$4 sm:$0xff]   ;;  %v5494_v18 = vld [vmem:[%s8179_s1 + $0x78] ss:$28 sps:$4 sm:$0xff]  }
   0x6   :  { %2402 = vmatprep.subr.bf16.mxu1 %v5484_v7  ;;  %v5490_v13 = vld [vmem:[%s8179_s1 + $0x44] ss:$28 sps:$4 sm:$0xff]   ;;  %v5496_v16 = vld [vmem:[%s8179_s1 + $0x7c] ss:$28 sps:$4 sm:$0xff]   ;;  %v5502_v20 = vld [vmem:[%s8179_s1 + $0xb4] ss:$28 sps:$4 sm:$0xff]  }
   0x7   :  { %v5498_v19 = vld [vmem:[%s8179_s1 + $0xe4] ss:$28 sps:$4 sm:$0xff]   ;;  %v5500_v21 = vld [vmem:[%s8179_s1 + $0xb0] ss:$28 sps:$4 sm:$0xff]   ;;  %v5504_v23 = vld [vmem:[%s8179_s1 + $0x11c] ss:$28 sps:$4 sm:$0xff]  }
   0x8   :  { %2241 = vmatpush1.bf16.msra.mxu0 %v5485_v8  ;;  %5080 = vmatmul.mubr.msk.bf16.vlgmr.msra.gmra.mrb[0].mxu1 %vm2234_vm0, %v6354_v10  ;;  %v5503_v22 = vld [vmem:[%s8179_s1 + $0xe0] ss:$28 sps:$4 sm:$0xff]   ;;  %v5508_v24 = vld [vmem:[%s8179_s1 + $0xec] ss:$28 sps:$4 sm:$0xff]   ;;  %v5509_v25 = vld [vmem:[%s8179_s1 + $0x118] ss:$28 sps:$4 sm:$0xff]  }
   0x9   :  { %2403 = vmatpush1.bf16.msra.mxu1 %v5482_v6  ;;  %2242 = vmatprep.subr.bf16.mxu0 %v5486_v11  ;;  %v5506_v26 = vld [vmem:[%s8179_s1 + $0xe8] ss:$28 sps:$4 sm:$0xff]   ;;  %v5510_v27 = vld [vmem:[%s8179_s1 + $0x154] ss:$28 sps:$4 sm:$0xff]   ;;  %v5512_v29 = vld [vmem:[%s8179_s1 + $0x120] ss:$28 sps:$4 sm:$0xff]  }
   0xa   :  { %2404 = vmatprep.subr.bf16.mxu1 %v5490_v13  ;;  %v5514_v28 = vld [vmem:[%s8179_s1 + $0x124] ss:$28 sps:$4 sm:$0xff]   ;;  %v5515_v30 = vld [vmem:[%s8179_s1 + $0x150] ss:$28 sps:$4 sm:$0xff]   ;;  %v5520_v32 = vld [vmem:[%s8179_s1 + $0x15c] ss:$28 sps:$4 sm:$0xff]  }
   0xb   :  { %v5516_v31 = vld [vmem:[%s8179_s1 + $0x18c] ss:$28 sps:$4 sm:$0xff]   ;;  %v5518_v34 = vld [vmem:[%s8179_s1 + $0x158] ss:$28 sps:$4 sm:$0xff]   ;;  %v5522_v35 = vld [vmem:[%s8179_s1 + $0x1c4] ss:$28 sps:$4 sm:$0xff]  }
   0xc   :  { %2243 = vmatpush1.bf16.msra.mxu0 %v5491_v14  ;;  %v5521_v33 = vld [vmem:[%s8179_s1 + $0x188] ss:$28 sps:$4 sm:$0xff]   ;;  %v5526_v36 = vld [vmem:[%s8179_s1 + $0x194] ss:$28 sps:$4 sm:$0xff]   ;;  %v5527_v38 = vld [vmem:[%s8179_s1 + $0x1c0] ss:$28 sps:$4 sm:$0xff]  }
   0xd   :  { %2405 = vmatpush1.bf16.msra.mxu1 %v5488_v12  ;;  %2244 = vmatprep.subr.bf16.mxu0 %v5492_v15  ;;  %v5524_v37 = vld [vmem:[%s8179_s1 + $0x190] ss:$28 sps:$4 sm:$0xff]   ;;  %v5528_v39 = vld [vmem:[%s8179_s1 + $0x1fc] ss:$28 sps:$4 sm:$0xff]   ;;  %v5530_v42 = vld [vmem:[%s8179_s1 + $0x1c8] ss:$28 sps:$4 sm:$0xff]  }
   0xe   :  { %2406 = vmatprep.subr.bf16.mxu1 %v5496_v16  ;;  %v5532_v40 = vld [vmem:[%s8179_s1 + $0x1cc] ss:$28 sps:$4 sm:$0xff]   ;;  %v5533_v41 = vld [vmem:[%s8179_s1 + $0x1f8] ss:$28 sps:$4 sm:$0xff]   ;;  %v5538_v44 = vld [vmem:[%s8179_s1 + $0x204] ss:$28 sps:$4 sm:$0xff]  }
   0xf   :  { %v5534_v43 = vld [vmem:[%s8179_s1 + $0x234] ss:$28 sps:$4 sm:$0xff]   ;;  %v5536_v45 = vld [vmem:[%s8179_s1 + $0x200] ss:$28 sps:$4 sm:$0xff]   ;;  %v5540_v47 = vld [vmem:[%s8179_s1 + $0x26c] ss:$28 sps:$4 sm:$0xff]  }
  0x10   :  { %2245 = vmatpush1.bf16.msra.mxu0 %v5497_v17  ;;  %v5539_v46 = vld [vmem:[%s8179_s1 + $0x230] ss:$28 sps:$4 sm:$0xff]   ;;  %v5544_v48 = vld [vmem:[%s8179_s1 + $0x23c] ss:$28 sps:$4 sm:$0xff]   ;;  %v5545_v50 = vld [vmem:[%s8179_s1 + $0x268] ss:$28 sps:$4 sm:$0xff]  }
  0x11   :  { %2407 = vmatpush1.bf16.msra.mxu1 %v5494_v18  ;;  %2246 = vmatprep.subr.bf16.mxu0 %v5498_v19  ;;  %v28_v49 = vld [vmem:[%s8180_s0 + $0x8] sm:$0xff]  ;;  %v5542_v52 = vld [vmem:[%s8179_s1 + $0x238] ss:$28 sps:$4 sm:$0xff]   ;;  %v5546_v53 = vld [vmem:[%s8179_s1 + $0x2a4] ss:$28 sps:$4 sm:$0xff]  }
  0x12   :  { %2408 = vmatprep.subr.bf16.mxu1 %v5502_v20  ;;  %v6478_v51 = vpack.c.bf16 %v28_v49, %v28_v49  ;;  %v5550_v54 = vld [vmem:[%s8179_s1 + $0x274] ss:$28 sps:$4 sm:$0xff]   ;;  %v5551_v56 = vld [vmem:[%s8179_s1 + $0x2a0] ss:$28 sps:$4 sm:$0xff]   ;;  %v5556_v58 = vld [vmem:[%s8179_s1 + $0x2ac] ss:$28 sps:$4 sm:$0xff]  }
  0x13   :  { %v5548_v55 = vld [vmem:[%s8179_s1 + $0x270] ss:$28 sps:$4 sm:$0xff]   ;;  %v5552_v57 = vld [vmem:[%s8179_s1 + $0x2dc] ss:$28 sps:$4 sm:$0xff]   ;;  %v5554_v59 = vld [vmem:[%s8179_s1 + $0x2a8] ss:$28 sps:$4 sm:$0xff]  }
  0x14   :  { %2247 = vmatpush1.bf16.msra.mxu0 %v5503_v22  ;;  %2270 = vmatprep.mubr.bf16.mxu0 %v6478_v51  ;;  %v5557_v60 = vld [vmem:[%s8179_s1 + $0x2d8] ss:$28 sps:$4 sm:$0xff]   ;;  %v5562_v62 = vld [vmem:[%s8179_s1 + $0x2e4] ss:$28 sps:$4 sm:$0xff]   ;;  %v5563_v0 = vld [vmem:[%s8179_s1 + $0x310] ss:$28 sps:$4 sm:$0xff]  }
  0x15   :  { %2409 = vmatpush1.bf16.msra.mxu1 %v5500_v21  ;;  %2248 = vmatprep.subr.bf16.mxu0 %v5504_v23  ;;  %v5558_v61 = vld [vmem:[%s8179_s1 + $0x314] ss:$28 sps:$4 sm:$0xff]   ;;  %v5560_v63 = vld [vmem:[%s8179_s1 + $0x2e0] ss:$28 sps:$4 sm:$0xff]   ;;  %v5564_v2 = vld [vmem:[%s8179_s1 + $0x34c] ss:$28 sps:$4 sm:$0xff]  }
  0x16   :  { %2410 = vmatprep.subr.bf16.mxu1 %v5508_v24  ;;  %2434 = vmatprep.mubr.bf16.mxu1 %v6478_v51  ;;  %v5568_v3 = vld [vmem:[%s8179_s1 + $0x31c] ss:$28 sps:$4 sm:$0xff]   ;;  %v5569_v5 = vld [vmem:[%s8179_s1 + $0x348] ss:$28 sps:$4 sm:$0xff]   ;;  %v5575_v8 = vld [vmem:[%s8179_s1 + $0x354] ss:$28 sps:$4 sm:$0xff]  }
  0x17   :  { %v5566_v4 = vld [vmem:[%s8179_s1 + $0x318] ss:$28 sps:$4 sm:$0xff]   ;;  %v27_v6 = vld [vmem:[%s8180_s0] sm:$0xff]  ;;  %v5573_v12 = vld [vmem:[%s8179_s1 + $0x350] ss:$28 sps:$4 sm:$0xff]  }
  0x18   :  { %2249 = vmatpush1.bf16.msra.mxu0 %v5509_v25  ;;  %v5572_v7 = vld [vmem:[%s8179_s1 + $0x384] ss:$28 sps:$4 sm:$0xff]   ;;  %v6542_v9 = vpack.c.bf16 %v27_v6, %v27_v6  ;;  %v5578_v13 = vld [vmem:[%s8179_s1 + $0x3bc] ss:$28 sps:$4 sm:$0xff]   ;;  %v5581_v14 = vld [vmem:[%s8179_s1 + $0x38c] ss:$28 sps:$4 sm:$0xff]  }
  0x19   :  { %2411 = vmatpush1.bf16.msra.mxu1 %v5506_v26  ;;  %2250 = vmatprep.subr.bf16.mxu0 %v5510_v27  ;;  %v5570_v11 = vld [vmem:[%s8179_s1 + $0x380] ss:$28 sps:$4 sm:$0xff]   ;;  %v5576_v15 = vld [vmem:[%s8179_s1 + $0x3b8] ss:$28 sps:$4 sm:$0xff]   ;;  %v5579_v16 = vld [vmem:[%s8179_s1 + $0x388] ss:$28 sps:$4 sm:$0xff]  }
  0x1a   :  { %2412 = vmatprep.subr.bf16.mxu1 %v5514_v28  ;;  %v5584_v17 = vld [vmem:[%s8179_s1 + $0x3f4] ss:$28 sps:$4 sm:$0xff]   ;;  %v5587_v18 = vld [vmem:[%s8179_s1 + $0x3c4] ss:$28 sps:$4 sm:$0xff]   ;;  %v5590_v21 = vld [vmem:[%s8179_s1 + $0x42c] ss:$28 sps:$4 sm:$0xff]  }
  0x1b   :  { %v5582_v19 = vld [vmem:[%s8179_s1 + $0x3f0] ss:$28 sps:$4 sm:$0xff]   ;;  %v5585_v20 = vld [vmem:[%s8179_s1 + $0x3c0] ss:$28 sps:$4 sm:$0xff]   ;;  %v5588_v23 = vld [vmem:[%s8179_s1 + $0x428] ss:$28 sps:$4 sm:$0xff]  }
  0x1c   :  { %2251 = vmatpush1.bf16.msra.mxu0 %v5515_v30  ;;  %v5593_v22 = vld [vmem:[%s8179_s1 + $0x3fc] ss:$28 sps:$4 sm:$0xff]   ;;  %v5596_v25 = vld [vmem:[%s8179_s1 + $0x464] ss:$28 sps:$4 sm:$0xff]   ;;  %v5599_v26 = vld [vmem:[%s8179_s1 + $0x434] ss:$28 sps:$4 sm:$0xff]  }
  0x1d   :  { %2413 = vmatpush1.bf16.msra.mxu1 %v5512_v29  ;;  %2252 = vmatprep.subr.bf16.mxu0 %v5516_v31  ;;  %v5591_v24 = vld [vmem:[%s8179_s1 + $0x3f8] ss:$28 sps:$4 sm:$0xff]   ;;  %v5594_v27 = vld [vmem:[%s8179_s1 + $0x460] ss:$28 sps:$4 sm:$0xff]   ;;  %v5597_v28 = vld [vmem:[%s8179_s1 + $0x430] ss:$28 sps:$4 sm:$0xff]  }
  0x1e   :  { %2414 = vmatprep.subr.bf16.mxu1 %v5520_v32  ;;  %v5602_v29 = vld [vmem:[%s8179_s1 + $0x49c] ss:$28 sps:$4 sm:$0xff]   ;;  %v5605_v30 = vld [vmem:[%s8179_s1 + $0x46c] ss:$28 sps:$4 sm:$0xff]   ;;  %v5659_v6 = vld [vmem:[%s8179_s1 + $0x664] ss:$28 sps:$4 sm:$0xff]  }
  0x1f   :  { %v5600_v31 = vld [vmem:[%s8179_s1 + $0x498] ss:$28 sps:$4 sm:$0xff]   ;;  %v5603_v32 = vld [vmem:[%s8179_s1 + $0x468] ss:$28 sps:$4 sm:$0xff]  }
  0x20   :  { %2253 = vmatpush1.bf16.msra.mxu0 %v5521_v33  ;;  %v5608_v33 = vld [vmem:[%s8179_s1 + $0x4d4] ss:$28 sps:$4 sm:$0xff]  }
  0x21   :  { %2415 = vmatpush1.bf16.msra.mxu1 %v5518_v34  ;;  %2254 = vmatprep.subr.bf16.mxu0 %v5522_v35  ;;  %v5611_v34 = vld [vmem:[%s8179_s1 + $0x4a4] ss:$28 sps:$4 sm:$0xff]   ;;  %v30_v35 = vld [vmem:[%s8180_s0 + $0x18] sm:$0xff] }
  0x22   :  { %2416 = vmatprep.subr.bf16.mxu1 %v5526_v36  ;;  %v6621_v36 = vpack.c.bf16 %v30_v35, %v30_v35  ;;  %v5624_v49 = vld [vmem:[%s8179_s1 + $0x578] ss:$28 sps:$4 sm:$0xff]   ;;  %v5692_v35 = vld [vmem:[%s8179_s1 + $0x7e4] ss:$28 sps:$4 sm:$0xff]  }
  0x24   :  { %2255 = vmatpush1.bf16.msra.mxu0 %v5527_v38  ;;  %v5609_v38 = vld [vmem:[%s8179_s1 + $0x4a0] ss:$28 sps:$4 sm:$0xff]  }
  0x25   :  { %2417 = vmatpush1.bf16.msra.mxu1 %v5524_v37  ;;  %2256 = vmatprep.subr.bf16.mxu0 %v5528_v39  ;;  %v5606_v37 = vld [vmem:[%s8179_s1 + $0x4d0] ss:$28 sps:$4 sm:$0xff]  }
  0x26   :  { %2418 = vmatprep.subr.bf16.mxu1 %v5532_v40  ;;  %v5614_v39 = vld [vmem:[%s8179_s1 + $0x50c] ss:$28 sps:$4 sm:$0xff]   ;;  %v5617_v40 = vld [vmem:[%s8179_s1 + $0x4dc] ss:$28 sps:$4 sm:$0xff]  }
  0x28   :  { %2257 = vmatpush1.bf16.msra.mxu0 %v5533_v41  ;;  %v5612_v41 = vld [vmem:[%s8179_s1 + $0x508] ss:$28 sps:$4 sm:$0xff]  }
  0x29   :  { %2419 = vmatpush1.bf16.msra.mxu1 %v5530_v42  ;;  %2258 = vmatprep.subr.bf16.mxu0 %v5534_v43  ;;  %v5615_v42 = vld [vmem:[%s8179_s1 + $0x4d8] ss:$28 sps:$4 sm:$0xff]   ;;  %v5620_v43 = vld [vmem:[%s8179_s1 + $0x544] ss:$28 sps:$4 sm:$0xff]  }
  0x2a   :  { %2420 = vmatprep.subr.bf16.mxu1 %v5538_v44  ;;  %v5623_v44 = vld [vmem:[%s8179_s1 + $0x514] ss:$28 sps:$4 sm:$0xff]  }
  0x2c   :  { %2259 = vmatpush1.bf16.msra.mxu0 %v5539_v46  ;;  %v5621_v46 = vld [vmem:[%s8179_s1 + $0x510] ss:$28 sps:$4 sm:$0xff]  }
  0x2d   :  { %2421 = vmatpush1.bf16.msra.mxu1 %v5536_v45  ;;  %2260 = vmatprep.subr.bf16.mxu0 %v5540_v47  ;;  %v5618_v45 = vld [vmem:[%s8179_s1 + $0x540] ss:$28 sps:$4 sm:$0xff]  }
  0x2e   :  { %2422 = vmatprep.subr.bf16.mxu1 %v5544_v48  ;;  %v5626_v47 = vld [vmem:[%s8179_s1 + $0x57c] ss:$28 sps:$4 sm:$0xff]   ;;  %v5629_v48 = vld [vmem:[%s8179_s1 + $0x54c] ss:$28 sps:$4 sm:$0xff]  }
  0x30   :  { %2261 = vmatpush1.bf16.msra.mxu0 %v5545_v50  ;;  %v5627_v50 = vld [vmem:[%s8179_s1 + $0x548] ss:$28 sps:$4 sm:$0xff]  }
  0x31   :  { %2423 = vmatpush1.bf16.msra.mxu1 %v5542_v52  ;;  %2262 = vmatprep.subr.bf16.mxu0 %v5546_v53  ;;  %v5632_v52 = vld [vmem:[%s8179_s1 + $0x5b4] ss:$28 sps:$4 sm:$0xff]   ;;  %v5635_v53 = vld [vmem:[%s8179_s1 + $0x584] ss:$28 sps:$4 sm:$0xff]  }
  0x32   :  { %2424 = vmatprep.subr.bf16.mxu1 %v5550_v54  ;;  %v5630_v54 = vld [vmem:[%s8179_s1 + $0x5b0] ss:$28 sps:$4 sm:$0xff]  }
  0x34   :  { %2263 = vmatpush1.bf16.msra.mxu0 %v5551_v56  ;;  %v5638_v56 = vld [vmem:[%s8179_s1 + $0x5ec] ss:$28 sps:$4 sm:$0xff]  }
  0x35   :  { %2425 = vmatpush1.bf16.msra.mxu1 %v5548_v55  ;;  %2264 = vmatprep.subr.bf16.mxu0 %v5552_v57  ;;  %v5633_v55 = vld [vmem:[%s8179_s1 + $0x580] ss:$28 sps:$4 sm:$0xff]  }
  0x36   :  { %2426 = vmatprep.subr.bf16.mxu1 %v5556_v58  ;;  %v5641_v57 = vld [vmem:[%s8179_s1 + $0x5bc] ss:$28 sps:$4 sm:$0xff]   ;;  %v5636_v58 = vld [vmem:[%s8179_s1 + $0x5e8] ss:$28 sps:$4 sm:$0xff]  }
  0x38   :  { %2265 = vmatpush1.bf16.msra.mxu0 %v5557_v60  ;;  %v5644_v60 = vld [vmem:[%s8179_s1 + $0x624] ss:$28 sps:$4 sm:$0xff]  }
  0x39   :  { %2427 = vmatpush1.bf16.msra.mxu1 %v5554_v59  ;;  %2266 = vmatprep.subr.bf16.mxu0 %v5558_v61  ;;  %v5639_v59 = vld [vmem:[%s8179_s1 + $0x5b8] ss:$28 sps:$4 sm:$0xff]  }
  0x3a   :  { %2428 = vmatprep.subr.bf16.mxu1 %v5562_v62  ;;  %v5647_v61 = vld [vmem:[%s8179_s1 + $0x5f4] ss:$28 sps:$4 sm:$0xff]   ;;  %v5642_v62 = vld [vmem:[%s8179_s1 + $0x620] ss:$28 sps:$4 sm:$0xff]  }
  0x3c   :  { %2267 = vmatpush1.bf16.msra.mxu0 %v5563_v0  ;;  %v5650_v0 = vld [vmem:[%s8179_s1 + $0x65c] ss:$28 sps:$4 sm:$0xff]  }
  0x3d   :  { %2429 = vmatpush1.bf16.msra.mxu1 %v5560_v63  ;;  %2268 = vmatprep.subr.bf16.mxu0 %v5564_v2  ;;  %v5645_v63 = vld [vmem:[%s8179_s1 + $0x5f0] ss:$28 sps:$4 sm:$0xff]  }
  0x3e   :  { %2430 = vmatprep.subr.bf16.mxu1 %v5568_v3  ;;  %v5653_v2 = vld [vmem:[%s8179_s1 + $0x62c] ss:$28 sps:$4 sm:$0xff]   ;;  %v5648_v3 = vld [vmem:[%s8179_s1 + $0x658] ss:$28 sps:$4 sm:$0xff]  }
  0x40   :  { %2269 = vmatpush1.bf16.msra.mxu0 %v5569_v5  ;;  %v5656_v5 = vld [vmem:[%s8179_s1 + $0x694] ss:$28 sps:$4 sm:$0xff]  }
  0x41   :  { %2431 = vmatpush1.bf16.msra.mxu1 %v5566_v4  ;;  %2279 = vmatprep.subr.bf16.mxu0 %v5572_v7  ;;  %v5651_v4 = vld [vmem:[%s8179_s1 + $0x628] ss:$28 sps:$4 sm:$0xff]   ;;  %v5654_v7 = vld [vmem:[%s8179_s1 + $0x690] ss:$28 sps:$4 sm:$0xff]  }
  0x42   :  { %2432 = vmatprep.subr.bf16.mxu1 %v5575_v8  ;;  %v5657_v8 = vld [vmem:[%s8179_s1 + $0x660] ss:$28 sps:$4 sm:$0xff]  }
  0x43   :  { %2271 = vmatmul.mubr.bf16.vlgmr.msra.gmra.mrb[0].mxu0 %v6542_v9 }
  0x44   :  { %2280 = vmatpush1.bf16.msra.mxu0 %v5570_v11  ;;  %2311 = vmatprep.mubr.bf16.mxu0 %v6621_v36  ;;  %v5662_v11 = vld [vmem:[%s8179_s1 + $0x6cc] ss:$28 sps:$4 sm:$0xff]  }
  0x45   :  { %2433 = vmatpush1.bf16.msra.mxu1 %v5573_v12  ;;  %2281 = vmatprep.subr.bf16.mxu0 %v5578_v13  ;;  %v5665_v12 = vld [vmem:[%s8179_s1 + $0x69c] ss:$28 sps:$4 sm:$0xff]   ;;  %v5660_v13 = vld [vmem:[%s8179_s1 + $0x6c8] ss:$28 sps:$4 sm:$0xff]  }
  0x46   :  { %2443 = vmatprep.subr.bf16.mxu1 %v5581_v14  ;;  %v29_v14 = vld [vmem:[%s8180_s0 + $0x10] sm:$0xff] }
  0x48   :  { %2282 = vmatpush1.bf16.msra.mxu0 %v5576_v15  ;;  %2435 = vmatmul.mubr.bf16.vlgmr.msra.gmra.mrb[4].mxu1 %v6542_v9  ;;  %v5663_v15 = vld [vmem:[%s8179_s1 + $0x698] ss:$28 sps:$4 sm:$0xff]  }
  0x49   :  { %2444 = vmatpush1.bf16.msra.mxu1 %v5579_v16  ;;  %2283 = vmatprep.subr.bf16.mxu0 %v5584_v17  ;;  %v5668_v16 = vld [vmem:[%s8179_s1 + $0x704] ss:$28 sps:$4 sm:$0xff]   ;;  %v5671_v17 = vld [vmem:[%s8179_s1 + $0x6d4] ss:$28 sps:$4 sm:$0xff]  }
  0x4a   :  { %2445 = vmatprep.subr.bf16.mxu1 %v5587_v18  ;;  %2475 = vmatprep.mubr.bf16.mxu1 %v6621_v36  ;;  %v6748_v18 = vpack.c.bf16 %v29_v14, %v29_v14  ;;  %v5744_v14 = vld [vmem:[%s8179_s1 + $0x9d8] ss:$28 sps:$4 sm:$0xff]  }
  0x4c   :  { %2284 = vmatpush1.bf16.msra.mxu0 %v5582_v19  ;;  %v5666_v19 = vld [vmem:[%s8179_s1 + $0x700] ss:$28 sps:$4 sm:$0xff]  }
  0x4d   :  { %2446 = vmatpush1.bf16.msra.mxu1 %v5585_v20  ;;  %2285 = vmatprep.subr.bf16.mxu0 %v5590_v21  ;;  %v5669_v20 = vld [vmem:[%s8179_s1 + $0x6d0] ss:$28 sps:$4 sm:$0xff]   ;;  %v5674_v21 = vld [vmem:[%s8179_s1 + $0x73c] ss:$28 sps:$4 sm:$0xff]  }
  0x4e   :  { %2447 = vmatprep.subr.bf16.mxu1 %v5593_v22  ;;  %v32_v22 = vld [vmem:[%s8180_s0 + $0x28] sm:$0xff] }
  0x50   :  { %2286 = vmatpush1.bf16.msra.mxu0 %v5588_v23  ;;  %v5677_v23 = vld [vmem:[%s8179_s1 + $0x70c] ss:$28 sps:$4 sm:$0xff]  }
  0x51   :  { %2448 = vmatpush1.bf16.msra.mxu1 %v5591_v24  ;;  %2287 = vmatprep.subr.bf16.mxu0 %v5596_v25  ;;  %v6765_v24 = vpack.c.bf16 %v32_v22, %v32_v22  ;;  %v5672_v25 = vld [vmem:[%s8179_s1 + $0x738] ss:$28 sps:$4 sm:$0xff]  }
  0x52   :  { %2449 = vmatprep.subr.bf16.mxu1 %v5599_v26  ;;  %v5675_v26 = vld [vmem:[%s8179_s1 + $0x708] ss:$28 sps:$4 sm:$0xff]   ;;  %v5761_v22 = vld [vmem:[%s8179_s1 + $0xa1c] ss:$28 sps:$4 sm:$0xff]  }
  0x54   :  { %2288 = vmatpush1.bf16.msra.mxu0 %v5594_v27  ;;  %v5680_v27 = vld [vmem:[%s8179_s1 + $0x774] ss:$28 sps:$4 sm:$0xff]  }
  0x55   :  { %2450 = vmatpush1.bf16.msra.mxu1 %v5597_v28  ;;  %2289 = vmatprep.subr.bf16.mxu0 %v5602_v29  ;;  %v5683_v28 = vld [vmem:[%s8179_s1 + $0x744] ss:$28 sps:$4 sm:$0xff]   ;;  %v5678_v29 = vld [vmem:[%s8179_s1 + $0x770] ss:$28 sps:$4 sm:$0xff]  }
  0x56   :  { %2451 = vmatprep.subr.bf16.mxu1 %v5605_v30  ;;  %v5681_v30 = vld [vmem:[%s8179_s1 + $0x740] ss:$28 sps:$4 sm:$0xff]  }
  0x58   :  { %2290 = vmatpush1.bf16.msra.mxu0 %v5600_v31  ;;  %v5686_v31 = vld [vmem:[%s8179_s1 + $0x7ac] ss:$28 sps:$4 sm:$0xff]  }
  0x59   :  { %2452 = vmatpush1.bf16.msra.mxu1 %v5603_v32  ;;  %2291 = vmatprep.subr.bf16.mxu0 %v5608_v33  ;;  %v5689_v32 = vld [vmem:[%s8179_s1 + $0x77c] ss:$28 sps:$4 sm:$0xff]   ;;  %v5684_v33 = vld [vmem:[%s8179_s1 + $0x7a8] ss:$28 sps:$4 sm:$0xff]  }
  0x5a   :  { %2453 = vmatprep.subr.bf16.mxu1 %v5611_v34  ;;  %v5687_v34 = vld [vmem:[%s8179_s1 + $0x778] ss:$28 sps:$4 sm:$0xff]  }
  0x5c   :  { %2292 = vmatpush1.bf16.msra.mxu0 %v5606_v37  ;;  %v5695_v37 = vld [vmem:[%s8179_s1 + $0x7b4] ss:$28 sps:$4 sm:$0xff]  }
  0x5d   :  { %2454 = vmatpush1.bf16.msra.mxu1 %v5609_v38  ;;  %2293 = vmatprep.subr.bf16.mxu0 %v5614_v39  ;;  %v5690_v38 = vld [vmem:[%s8179_s1 + $0x7e0] ss:$28 sps:$4 sm:$0xff]   ;;  %v5693_v39 = vld [vmem:[%s8179_s1 + $0x7b0] ss:$28 sps:$4 sm:$0xff]  }
  0x5e   :  { %2455 = vmatprep.subr.bf16.mxu1 %v5617_v40  ;;  %v5698_v40 = vld [vmem:[%s8179_s1 + $0x81c] ss:$28 sps:$4 sm:$0xff]  }
  0x60   :  { %2294 = vmatpush1.bf16.msra.mxu0 %v5612_v41  ;;  %v5701_v41 = vld [vmem:[%s8179_s1 + $0x7ec] ss:$28 sps:$4 sm:$0xff]  }
  0x61   :  { %2456 = vmatpush1.bf16.msra.mxu1 %v5615_v42  ;;  %2295 = vmatprep.subr.bf16.mxu0 %v5620_v43  ;;  %v5696_v42 = vld [vmem:[%s8179_s1 + $0x818] ss:$28 sps:$4 sm:$0xff]   ;;  %v5699_v43 = vld [vmem:[%s8179_s1 + $0x7e8] ss:$28 sps:$4 sm:$0xff]  }
  0x62   :  { %2457 = vmatprep.subr.bf16.mxu1 %v5623_v44  ;;  %v5704_v44 = vld [vmem:[%s8179_s1 + $0x854] ss:$28 sps:$4 sm:$0xff]  }
  0x64   :  { %2296 = vmatpush1.bf16.msra.mxu0 %v5618_v45  ;;  %v5707_v45 = vld [vmem:[%s8179_s1 + $0x824] ss:$28 sps:$4 sm:$0xff]  }
  0x65   :  { %2458 = vmatpush1.bf16.msra.mxu1 %v5621_v46  ;;  %2297 = vmatprep.subr.bf16.mxu0 %v5626_v47  ;;  %v5702_v46 = vld [vmem:[%s8179_s1 + $0x850] ss:$28 sps:$4 sm:$0xff]   ;;  %v5705_v47 = vld [vmem:[%s8179_s1 + $0x820] ss:$28 sps:$4 sm:$0xff]  }
  0x66   :  { %2459 = vmatprep.subr.bf16.mxu1 %v5629_v48  ;;  %v5710_v48 = vld [vmem:[%s8179_s1 + $0x88c] ss:$28 sps:$4 sm:$0xff]  }
  0x68   :  { %2298 = vmatpush1.bf16.msra.mxu0 %v5624_v49  ;;  %v5713_v49 = vld [vmem:[%s8179_s1 + $0x85c] ss:$28 sps:$4 sm:$0xff]  }
  0x69   :  { %2460 = vmatpush1.bf16.msra.mxu1 %v5627_v50  ;;  %2299 = vmatprep.subr.bf16.mxu0 %v5632_v52  ;;  %v5708_v50 = vld [vmem:[%s8179_s1 + $0x888] ss:$28 sps:$4 sm:$0xff]   ;;  %v5711_v52 = vld [vmem:[%s8179_s1 + $0x858] ss:$28 sps:$4 sm:$0xff]  }
  0x6a   :  { %2461 = vmatprep.subr.bf16.mxu1 %v5635_v53  ;;  %v5716_v53 = vld [vmem:[%s8179_s1 + $0x8c4] ss:$28 sps:$4 sm:$0xff]  }
  0x6c   :  { %2300 = vmatpush1.bf16.msra.mxu0 %v5630_v54  ;;  %v5719_v54 = vld [vmem:[%s8179_s1 + $0x894] ss:$28 sps:$4 sm:$0xff]  }
  0x6d   :  { %2462 = vmatpush1.bf16.msra.mxu1 %v5633_v55  ;;  %2301 = vmatprep.subr.bf16.mxu0 %v5638_v56  ;;  %v5714_v55 = vld [vmem:[%s8179_s1 + $0x8c0] ss:$28 sps:$4 sm:$0xff]   ;;  %v5717_v56 = vld [vmem:[%s8179_s1 + $0x890] ss:$28 sps:$4 sm:$0xff]  }
  0x6e   :  { %2463 = vmatprep.subr.bf16.mxu1 %v5641_v57  ;;  %v5722_v57 = vld [vmem:[%s8179_s1 + $0x8fc] ss:$28 sps:$4 sm:$0xff]  }
  0x70   :  { %2302 = vmatpush1.bf16.msra.mxu0 %v5636_v58  ;;  %v5725_v58 = vld [vmem:[%s8179_s1 + $0x8cc] ss:$28 sps:$4 sm:$0xff]  }
  0x71   :  { %2464 = vmatpush1.bf16.msra.mxu1 %v5639_v59  ;;  %2303 = vmatprep.subr.bf16.mxu0 %v5644_v60  ;;  %v5720_v59 = vld [vmem:[%s8179_s1 + $0x8f8] ss:$28 sps:$4 sm:$0xff]   ;;  %v5723_v60 = vld [vmem:[%s8179_s1 + $0x8c8] ss:$28 sps:$4 sm:$0xff]  }
  0x72   :  { %2465 = vmatprep.subr.bf16.mxu1 %v5647_v61  ;;  %v5728_v61 = vld [vmem:[%s8179_s1 + $0x934] ss:$28 sps:$4 sm:$0xff]  }
  0x74   :  { %2304 = vmatpush1.bf16.msra.mxu0 %v5642_v62  ;;  %v5731_v62 = vld [vmem:[%s8179_s1 + $0x904] ss:$28 sps:$4 sm:$0xff]  }
  0x75   :  { %2466 = vmatpush1.bf16.msra.mxu1 %v5645_v63  ;;  %2305 = vmatprep.subr.bf16.mxu0 %v5650_v0  ;;  %v5726_v63 = vld [vmem:[%s8179_s1 + $0x930] ss:$28 sps:$4 sm:$0xff]   ;;  %v5729_v0 = vld [vmem:[%s8179_s1 + $0x900] ss:$28 sps:$4 sm:$0xff]  }
  0x76   :  { %2467 = vmatprep.subr.bf16.mxu1 %v5653_v2  ;;  %v5734_v2 = vld [vmem:[%s8179_s1 + $0x96c] ss:$28 sps:$4 sm:$0xff]  }
  0x78   :  { %2306 = vmatpush1.bf16.msra.mxu0 %v5648_v3  ;;  %v5737_v3 = vld [vmem:[%s8179_s1 + $0x93c] ss:$28 sps:$4 sm:$0xff]  }
  0x79   :  { %2468 = vmatpush1.bf16.msra.mxu1 %v5651_v4  ;;  %2307 = vmatprep.subr.bf16.mxu0 %v5656_v5  ;;  %v5732_v4 = vld [vmem:[%s8179_s1 + $0x968] ss:$28 sps:$4 sm:$0xff]   ;;  %v5735_v5 = vld [vmem:[%s8179_s1 + $0x938] ss:$28 sps:$4 sm:$0xff]  }
  0x7a   :  { %2469 = vmatprep.subr.bf16.mxu1 %v5659_v6  ;;  %v5740_v6 = vld [vmem:[%s8179_s1 + $0x9a4] ss:$28 sps:$4 sm:$0xff]  }
  0x7c   :  { %2308 = vmatpush1.bf16.msra.mxu0 %v5654_v7  ;;  %v5743_v7 = vld [vmem:[%s8179_s1 + $0x974] ss:$28 sps:$4 sm:$0xff]  }
  0x7d   :  { %2470 = vmatpush1.bf16.msra.mxu1 %v5657_v8  ;;  %2309 = vmatprep.subr.bf16.mxu0 %v5662_v11  ;;  %v5738_v8 = vld [vmem:[%s8179_s1 + $0x9a0] ss:$28 sps:$4 sm:$0xff]   ;;  %v5741_v11 = vld [vmem:[%s8179_s1 + $0x970] ss:$28 sps:$4 sm:$0xff]  }
  0x7e   :  { %2471 = vmatprep.subr.bf16.mxu1 %v5665_v12  ;;  %v5746_v12 = vld [vmem:[%s8179_s1 + $0x9dc] ss:$28 sps:$4 sm:$0xff]  }
  0x80   :  { %2310 = vmatpush1.bf16.msra.mxu0 %v5660_v13  ;;  %v5749_v13 = vld [vmem:[%s8179_s1 + $0x9ac] ss:$28 sps:$4 sm:$0xff]  }
  0x81   :  { %2472 = vmatpush1.bf16.msra.mxu1 %v5663_v15  ;;  %2320 = vmatprep.subr.bf16.mxu0 %v5668_v16  ;;  %v5747_v15 = vld [vmem:[%s8179_s1 + $0x9a8] ss:$28 sps:$4 sm:$0xff]   ;;  %v5752_v16 = vld [vmem:[%s8179_s1 + $0xa14] ss:$28 sps:$4 sm:$0xff]  }
  0x82   :  { %2473 = vmatprep.subr.bf16.mxu1 %v5671_v17  ;;  %v5755_v17 = vld [vmem:[%s8179_s1 + $0x9e4] ss:$28 sps:$4 sm:$0xff]  }
  0x83   :  { %2312 = vmatmul.mubr.bf16.vlgmr.msra.gmra.mrb[0].mxu0 %v6748_v18 }
  0x84   :  { %2321 = vmatpush1.bf16.msra.mxu0 %v5666_v19  ;;  %2352 = vmatprep.mubr.bf16.mxu0 %v6765_v24  ;;  %v5750_v19 = vld [vmem:[%s8179_s1 + $0xa10] ss:$28 sps:$4 sm:$0xff]  }
  0x85   :  { %2474 = vmatpush1.bf16.msra.mxu1 %v5669_v20  ;;  %2322 = vmatprep.subr.bf16.mxu0 %v5674_v21  ;;  %v5753_v20 = vld [vmem:[%s8179_s1 + $0x9e0] ss:$28 sps:$4 sm:$0xff]   ;;  %v5758_v21 = vld [vmem:[%s8179_s1 + $0xa4c] ss:$28 sps:$4 sm:$0xff]  }
  0x86   :  { %2484 = vmatprep.subr.bf16.mxu1 %v5677_v23  ;;  %v5756_v23 = vld [vmem:[%s8179_s1 + $0xa48] ss:$28 sps:$4 sm:$0xff]  }
  0x88   :  { %2323 = vmatpush1.bf16.msra.mxu0 %v5672_v25  ;;  %2476 = vmatmul.mubr.bf16.vlgmr.msra.gmra.mrb[4].mxu1 %v6748_v18  ;;  %v5759_v25 = vld [vmem:[%s8179_s1 + $0xa18] ss:$28 sps:$4 sm:$0xff]  }
  0x89   :  { %2485 = vmatpush1.bf16.msra.mxu1 %v5675_v26  ;;  %2324 = vmatprep.subr.bf16.mxu0 %v5680_v27  ;;  %v31_v26 = vld [vmem:[%s8180_s0 + $0x20] sm:$0xff]  ;;  %v5767_v27 = vld [vmem:[%s8179_s1 + $0x14] ss:$28 sps:$4 sm:$0xff]  }
  0x8a   :  { %2486 = vmatprep.subr.bf16.mxu1 %v5683_v28  ;;  %2516 = vmatprep.mubr.bf16.mxu1 %v6765_v24  ;;  %v5764_v28 = vld [vmem:[%s8179_s1 + $0xa54] ss:$28 sps:$4 sm:$0xff]  }
  0x8c   :  { %2325 = vmatpush1.bf16.msra.mxu0 %v5678_v29  ;;  %v6954_v29 = vpack.c.bf16 %v31_v26, %v31_v26  ;;  %v5821_v26 = vld [vmem:[%s8179_s1 + $0x320] ss:$28 sps:$4 sm:$0xff]  }
  0x8d   :  { %2487 = vmatpush1.bf16.msra.mxu1 %v5681_v30  ;;  %2326 = vmatprep.subr.bf16.mxu0 %v5686_v31  ;;  %v5762_v30 = vld [vmem:[%s8179_s1 + $0xa50] ss:$28 sps:$4 sm:$0xff]  }
  0x8e   :  { %2488 = vmatprep.subr.bf16.mxu1 %v5689_v32  ;;  %v5765_v31 = vld [vmem:[%s8179_s1 + $0x10] ss:$28 sps:$4 sm:$0xff]  }
  0x8f   :  { %v5770_v32 = vld [vmem:[%s8179_s1 + $0x4c] ss:$28 sps:$4 sm:$0xff]  }
  0x90   :  { %2327 = vmatpush1.bf16.msra.mxu0 %v5684_v33  ;;  %v5776_v33 = vld [vmem:[%s8179_s1 + $0xa8c] ss:$28 sps:$4 sm:$0xff]  }
  0x91   :  { %2489 = vmatpush1.bf16.msra.mxu1 %v5687_v34  ;;  %2328 = vmatprep.subr.bf16.mxu0 %v5692_v35  ;;  %v5768_v34 = vld [vmem:[%s8179_s1 + $0x48] ss:$28 sps:$4 sm:$0xff]  }
  0x92   :  { %2490 = vmatprep.subr.bf16.mxu1 %v5695_v37  ;;  %v5773_v35 = vld [vmem:[%s8179_s1 + $0x84] ss:$28 sps:$4 sm:$0xff]  }
  0x93   :  { %v5774_v37 = vld [vmem:[%s8179_s1 + $0xa88] ss:$28 sps:$4 sm:$0xff]  }
  0x94   :  { %2329 = vmatpush1.bf16.msra.mxu0 %v5690_v38  ;;  %v5800_v38 = vld [vmem:[%s8179_s1 + $0xa94] ss:$28 sps:$4 sm:$0xff]  }
  0x95   :  { %2491 = vmatpush1.bf16.msra.mxu1 %v5693_v39  ;;  %2330 = vmatprep.subr.bf16.mxu0 %v5698_v40  ;;  %v5771_v39 = vld [vmem:[%s8179_s1 + $0x80] ss:$28 sps:$4 sm:$0xff]  }
  0x96   :  { %2492 = vmatprep.subr.bf16.mxu1 %v5701_v41  ;;  %v5779_v40 = vld [vmem:[%s8179_s1 + $0xbc] ss:$28 sps:$4 sm:$0xff]  }
  0x97   :  { %v5777_v41 = vld [vmem:[%s8179_s1 + $0xb8] ss:$28 sps:$4 sm:$0xff]  }
  0x98   :  { %2331 = vmatpush1.bf16.msra.mxu0 %v5696_v42  ;;  %v5782_v42 = vld [vmem:[%s8179_s1 + $0xf4] ss:$28 sps:$4 sm:$0xff]  }
  0x99   :  { %2493 = vmatpush1.bf16.msra.mxu1 %v5699_v43  ;;  %2332 = vmatprep.subr.bf16.mxu0 %v5704_v44  ;;  %v5780_v43 = vld [vmem:[%s8179_s1 + $0xf0] ss:$28 sps:$4 sm:$0xff]  }
  0x9a   :  { %2494 = vmatprep.subr.bf16.mxu1 %v5707_v45  ;;  %v5785_v44 = vld [vmem:[%s8179_s1 + $0x12c] ss:$28 sps:$4 sm:$0xff]  }
  0x9b   :  { %v5798_v45 = vld [vmem:[%s8179_s1 + $0xa90] ss:$28 sps:$4 sm:$0xff]  }
  0x9c   :  { %2333 = vmatpush1.bf16.msra.mxu0 %v5702_v46  ;;  %v5804_v46 = vld [vmem:[%s8179_s1 + $0x1d8] ss:$28 sps:$4 sm:$0xff]  }
  0x9d   :  { %2495 = vmatpush1.bf16.msra.mxu1 %v5705_v47  ;;  %2334 = vmatprep.subr.bf16.mxu0 %v5710_v48  ;;  %v5783_v47 = vld [vmem:[%s8179_s1 + $0x128] ss:$28 sps:$4 sm:$0xff]  }
  0x9e   :  { %2496 = vmatprep.subr.bf16.mxu1 %v5713_v49  ;;  %v5788_v48 = vld [vmem:[%s8179_s1 + $0x164] ss:$28 sps:$4 sm:$0xff]  }
  0x9f   :  { %v5786_v49 = vld [vmem:[%s8179_s1 + $0x160] ss:$28 sps:$4 sm:$0xff]  }
  0xa0   :  { %2335 = vmatpush1.bf16.msra.mxu0 %v5708_v50  ;;  %v5791_v50 = vld [vmem:[%s8179_s1 + $0x19c] ss:$28 sps:$4 sm:$0xff]  }
  0xa1   :  { %2497 = vmatpush1.bf16.msra.mxu1 %v5711_v52  ;;  %2336 = vmatprep.subr.bf16.mxu0 %v5716_v53  ;;  %v5805_v52 = vld [vmem:[%s8179_s1 + $0x18] ss:$28 sps:$4 sm:$0xff]  }
  0xa2   :  { %2498 = vmatprep.subr.bf16.mxu1 %v5719_v54  ;;  %v5789_v53 = vld [vmem:[%s8179_s1 + $0x198] ss:$28 sps:$4 sm:$0xff]   ;;  %v5809_v54 = vld [vmem:[%s8179_s1 + $0x210] ss:$28 sps:$4 sm:$0xff]  }
  0xa4   :  { %2337 = vmatpush1.bf16.msra.mxu0 %v5714_v55 }
  0xa5   :  { %2499 = vmatpush1.bf16.msra.mxu1 %v5717_v56  ;;  %2338 = vmatprep.subr.bf16.mxu0 %v5722_v57  ;;  %v5794_v56 = vld [vmem:[%s8179_s1 + $0x1d4] ss:$28 sps:$4 sm:$0xff]  }
  0xa6   :  { %2500 = vmatprep.subr.bf16.mxu1 %v5725_v58  ;;  %v5810_v58 = vld [vmem:[%s8179_s1 + $0x50] ss:$28 sps:$4 sm:$0xff]  }
  0xa8   :  { %2339 = vmatpush1.bf16.msra.mxu0 %v5720_v59 }
  0xa9   :  { %2501 = vmatpush1.bf16.msra.mxu1 %v5723_v60  ;;  %2340 = vmatprep.subr.bf16.mxu0 %v5728_v61  ;;  %v5814_v60 = vld [vmem:[%s8179_s1 + $0x248] ss:$28 sps:$4 sm:$0xff]  }
  0xaa   :  { %2502 = vmatprep.subr.bf16.mxu1 %v5731_v62  ;;  %v5792_v62 = vld [vmem:[%s8179_s1 + $0x1d0] ss:$28 sps:$4 sm:$0xff]  }
  0xac   :  { %2341 = vmatpush1.bf16.msra.mxu0 %v5726_v63  ;;  %v5797_v63 = vld [vmem:[%s8179_s1 + $0x20c] ss:$28 sps:$4 sm:$0xff]  }
  0xad   :  { %2503 = vmatpush1.bf16.msra.mxu1 %v5729_v0  ;;  %2342 = vmatprep.subr.bf16.mxu0 %v5734_v2  ;;  %v5815_v0 = vld [vmem:[%s8179_s1 + $0x88] ss:$28 sps:$4 sm:$0xff]  }
  0xae   :  { %2504 = vmatprep.subr.bf16.mxu1 %v5737_v3  ;;  %v5795_v2 = vld [vmem:[%s8179_s1 + $0x208] ss:$28 sps:$4 sm:$0xff]  }
  0xaf   :  { %v5803_v3 = vld [vmem:[%s8179_s1 + $0x244] ss:$28 sps:$4 sm:$0xff]  }
  0xb0   :  { %2343 = vmatpush1.bf16.msra.mxu0 %v5732_v4  ;;  %v5820_v4 = vld [vmem:[%s8179_s1 + $0xc0] ss:$28 sps:$4 sm:$0xff]  }
  0xb1   :  { %2505 = vmatpush1.bf16.msra.mxu1 %v5735_v5  ;;  %2344 = vmatprep.subr.bf16.mxu0 %v5740_v6  ;;  %v5824_v5 = vld [vmem:[%s8179_s1 + $0x2b8] ss:$28 sps:$4 sm:$0xff]   ;;  %v5801_v6 = vld [vmem:[%s8179_s1 + $0x240] ss:$28 sps:$4 sm:$0xff]  }
  0xb2   :  { %2506 = vmatprep.subr.bf16.mxu1 %v5743_v7  ;;  %v5808_v7 = vld [vmem:[%s8179_s1 + $0x27c] ss:$28 sps:$4 sm:$0xff]  }
  0xb4   :  { %2345 = vmatpush1.bf16.msra.mxu0 %v5738_v8  ;;  %v5825_v8 = vld [vmem:[%s8179_s1 + $0xf8] ss:$28 sps:$4 sm:$0xff]  }
  0xb5   :  { %2507 = vmatpush1.bf16.msra.mxu1 %v5741_v11  ;;  %2346 = vmatprep.subr.bf16.mxu0 %v5746_v12  ;;  %v5829_v11 = vld [vmem:[%s8179_s1 + $0x2f0] ss:$28 sps:$4 sm:$0xff]   ;;  %v5806_v12 = vld [vmem:[%s8179_s1 + $0x278] ss:$28 sps:$4 sm:$0xff]  }
  0xb6   :  { %2508 = vmatprep.subr.bf16.mxu1 %v5749_v13  ;;  %v5813_v13 = vld [vmem:[%s8179_s1 + $0x2b4] ss:$28 sps:$4 sm:$0xff]  }
  0xb8   :  { %2347 = vmatpush1.bf16.msra.mxu0 %v5744_v14  ;;  %v5830_v14 = vld [vmem:[%s8179_s1 + $0x130] ss:$28 sps:$4 sm:$0xff]  }
  0xb9   :  { %2509 = vmatpush1.bf16.msra.mxu1 %v5747_v15  ;;  %2348 = vmatprep.subr.bf16.mxu0 %v5752_v16  ;;  %v5834_v15 = vld [vmem:[%s8179_s1 + $0x328] ss:$28 sps:$4 sm:$0xff]   ;;  %v5811_v16 = vld [vmem:[%s8179_s1 + $0x2b0] ss:$28 sps:$4 sm:$0xff]  }
  0xba   :  { %2510 = vmatprep.subr.bf16.mxu1 %v5755_v17  ;;  %v5818_v17 = vld [vmem:[%s8179_s1 + $0x2ec] ss:$28 sps:$4 sm:$0xff]  }
  0xbc   :  { %2349 = vmatpush1.bf16.msra.mxu0 %v5750_v19  ;;  %v5835_v19 = vld [vmem:[%s8179_s1 + $0x168] ss:$28 sps:$4 sm:$0xff]  }
  0xbd   :  { %2511 = vmatpush1.bf16.msra.mxu1 %v5753_v20  ;;  %2350 = vmatprep.subr.bf16.mxu0 %v5758_v21  ;;  %v5839_v20 = vld [vmem:[%s8179_s1 + $0x360] ss:$28 sps:$4 sm:$0xff]   ;;  %v5816_v21 = vld [vmem:[%s8179_s1 + $0x2e8] ss:$28 sps:$4 sm:$0xff]  }
  0xbe   :  { %2512 = vmatprep.subr.bf16.mxu1 %v5761_v22  ;;  %v5823_v22 = vld [vmem:[%s8179_s1 + $0x324] ss:$28 sps:$4 sm:$0xff]  }
  0xc0   :  { %2351 = vmatpush1.bf16.msra.mxu0 %v5756_v23  ;;  %v5840_v23 = vld [vmem:[%s8179_s1 + $0x1a0] ss:$28 sps:$4 sm:$0xff]  }
  0xc1   :  { %2513 = vmatpush1.bf16.msra.mxu1 %v5759_v25  ;;  %2566 = vmatprep.subr.bf16.mxu0 %v5767_v27  ;;  %v5844_v25 = vld [vmem:[%s8179_s1 + $0x558] ss:$28 sps:$4 sm:$0xff]  }
  0xc2   :  { %2514 = vmatprep.subr.bf16.mxu1 %v5764_v28  ;;  %v5828_v27 = vld [vmem:[%s8179_s1 + $0x35c] ss:$28 sps:$4 sm:$0xff]  }
  0xc3   :  { %2353 = vmatmul.mubr.bf16.vlgmr.msra.gmra.mrb[0].mxu0 %v6954_v29  ;;  %v5845_v28 = vld [vmem:[%s8179_s1 + $0x398] ss:$28 sps:$4 sm:$0xff]  }
  0xc4   :  { %2567 = vmatpush1.bf16.msra.mxu0 %v5765_v31  ;;  %2598 = vmatprep.mubr.bf16.mxu0 %v6478_v51  ;;  %v5826_v31 = vld [vmem:[%s8179_s1 + $0x358] ss:$28 sps:$4 sm:$0xff]  }
  0xc5   :  { %2515 = vmatpush1.bf16.msra.mxu1 %v5762_v30  ;;  %2568 = vmatprep.subr.bf16.mxu0 %v5770_v32  ;;  %v5849_v30 = vld [vmem:[%s8179_s1 + $0x590] ss:$28 sps:$4 sm:$0xff]  }
  0xc6   :  { %2525 = vmatprep.subr.bf16.mxu1 %v5776_v33  ;;  %v5833_v32 = vld [vmem:[%s8179_s1 + $0x394] ss:$28 sps:$4 sm:$0xff]  }
  0xc7   :  { %v5850_v33 = vld [vmem:[%s8179_s1 + $0x3d0] ss:$28 sps:$4 sm:$0xff]  }
  0xc8   :  { %2517 = vmatmul.mubr.bf16.vlgmr.msra.gmra.mrb[4].mxu1 %v6954_v29  ;;  %2569 = vmatpush1.bf16.msra.mxu0 %v5768_v34  ;;  %v5854_v34 = vld [vmem:[%s8179_s1 + $0x5c8] ss:$28 sps:$4 sm:$0xff]  }
  0xc9   :  { %2570 = vmatprep.subr.bf16.mxu0 %v5773_v35  ;;  %2526 = vmatpush1.bf16.msra.mxu1 %v5774_v37  ;;  %v5831_v35 = vld [vmem:[%s8179_s1 + $0x390] ss:$28 sps:$4 sm:$0xff]  }
  0xca   :  { %2557 = vmatprep.mubr.bf16.mxu1 %v6283_v1  ;;  %2689 = vmatprep.subr.bf16.mxu1 %v5800_v38  ;;  %v5838_v37 = vld [vmem:[%s8179_s1 + $0x3cc] ss:$28 sps:$4 sm:$0xff]  }
  0xcb   :  { %v5855_v38 = vld [vmem:[%s8179_s1 + $0x408] ss:$28 sps:$4 sm:$0xff]  }
  0xcc   :  { %2571 = vmatpush1.bf16.msra.mxu0 %v5771_v39  ;;  %v5859_v39 = vld [vmem:[%s8179_s1 + $0x600] ss:$28 sps:$4 sm:$0xff]  }
  0xcd   :  { %2572 = vmatprep.subr.bf16.mxu0 %v5779_v40  ;;  %v5836_v40 = vld [vmem:[%s8179_s1 + $0x3c8] ss:$28 sps:$4 sm:$0xff]  }
  0xd0   :  { %2573 = vmatpush1.bf16.msra.mxu0 %v5777_v41  ;;  %v5843_v41 = vld [vmem:[%s8179_s1 + $0x404] ss:$28 sps:$4 sm:$0xff]  }
  0xd1   :  { %2574 = vmatprep.subr.bf16.mxu0 %v5782_v42  ;;  %v5860_v42 = vld [vmem:[%s8179_s1 + $0x440] ss:$28 sps:$4 sm:$0xff]  }
  0xd4   :  { %5081 = vmatmul.mubr.msk.bf16.vlgmr.msra.gmra.mrb[4].mxu1 %vm2234_vm0, %v6354_v10  ;;  %2575 = vmatpush1.bf16.msra.mxu0 %v5780_v43  ;;  %v5848_v43 = vld [vmem:[%s8179_s1 + $0x43c] ss:$28 sps:$4 sm:$0xff]  }
  0xd5   :  { %2576 = vmatprep.subr.bf16.mxu0 %v5785_v44  ;;  %2690 = vmatpush1.bf16.msra.mxu1 %v5798_v45  ;;  %v5865_v44 = vld [vmem:[%s8179_s1 + $0x478] ss:$28 sps:$4 sm:$0xff]   ;;  %v5869_v45 = vld [vmem:[%s8179_s1 + $0x670] ss:$28 sps:$4 sm:$0xff]  }
  0xd6   :  { %2721 = vmatprep.mubr.bf16.mxu1 %v6283_v1  ;;  %5309 = vmatprep.subr.bf16.mxu1 %v5804_v46  ;;  %v5846_v46 = vld [vmem:[%s8179_s1 + $0x438] ss:$28 sps:$4 sm:$0xff]  }
  0xd8   :  { %2577 = vmatpush1.bf16.msra.mxu0 %v5783_v47  ;;  %v5853_v47 = vld [vmem:[%s8179_s1 + $0x474] ss:$28 sps:$4 sm:$0xff]  }
  0xd9   :  { %2578 = vmatprep.subr.bf16.mxu0 %v5788_v48  ;;  %v5870_v48 = vld [vmem:[%s8179_s1 + $0x4b0] ss:$28 sps:$4 sm:$0xff]  }
  0xdb   :  { %v7032_v55 = vpop.f32.mrb[0].mxu1 }
  0xdc   :  { %2579 = vmatpush1.bf16.msra.mxu0 %v5786_v49  ;;  %5082 = vmatmul.mubr.msk.bf16.vlgmr.msra.gmra.mrb[8].mxu1 %vm2234_vm0, %v6354_v10  ;;  %v7039_v57 = vpop.f32.mrb[1].mxu1  ;;  %v5874_v49 = vld [vmem:[%s8179_s1 + $0x6a8] ss:$28 sps:$4 sm:$0xff]  }
  0xdd   :  { %2580 = vmatprep.subr.bf16.mxu0 %v5791_v50  ;;  %5310 = vmatpush3.bf16.msra.mxu1 %v5805_v52  ;;  %v2399_v59 = vpop.f32.mrb[2].mxu1  ;;  %v5851_v50 = vld [vmem:[%s8179_s1 + $0x470] ss:$28 sps:$4 sm:$0xff]  }
  0xde   :  { %5311 = vmatprep.subr.bf16.mxu1 %v5809_v54  ;;  %2762 = vmatprep.mubr.bf16.mxu1 %v6478_v51  ;;  %v2400_v61 = vpop.f32.mrb[3].mxu1  ;;  %v5819_v51 = vld [vmem:[%s8179_s1 + $0x280] ss:$28 sps:$4 sm:$0xff]   ;;  %v5858_v52 = vld [vmem:[%s8179_s1 + $0x4ac] ss:$28 sps:$4 sm:$0xff]  }
  0xdf   :  { %v5879_v54 = vld [vmem:[%s8179_s1 + $0x6e0] ss:$28 sps:$4 sm:$0xff]  }
  0xe0   :  { %2581 = vmatpush1.bf16.msra.mxu0 %v5789_v53  ;;  %v5875_v53 = vld [vmem:[%s8179_s1 + $0x4e8] ss:$28 sps:$4 sm:$0xff]   ;;  %v5880_v59 = vld [vmem:[%s8179_s1 + $0x520] ss:$28 sps:$4 sm:$0xff]  }
  0xe1   :  { %2582 = vmatprep.subr.bf16.mxu0 %v5794_v56  ;;  %5312 = vmatpush3.bf16.msra.mxu1 %v5810_v58  ;;  %v5856_v56 = vld [vmem:[%s8179_s1 + $0x4a8] ss:$28 sps:$4 sm:$0xff]   ;;  %v5861_v61 = vld [vmem:[%s8179_s1 + $0x4e0] ss:$28 sps:$4 sm:$0xff]  }
  0xe2   :  { %5313 = vmatprep.subr.bf16.mxu1 %v5814_v60  ;;  %v5863_v58 = vld [vmem:[%s8179_s1 + $0x4e4] ss:$28 sps:$4 sm:$0xff]   ;;  %v5884_v60 = vld [vmem:[%s8179_s1 + $0x8d8] ss:$28 sps:$4 sm:$0xff]  }
  0xe4   :  { %2583 = vmatpush1.bf16.msra.mxu0 %v5792_v62  ;;  %v5868_v62 = vld [vmem:[%s8179_s1 + $0x51c] ss:$28 sps:$4 sm:$0xff]  }
  0xe5   :  { %2584 = vmatprep.subr.bf16.mxu0 %v5797_v63  ;;  %5314 = vmatpush3.bf16.msra.mxu1 %v5815_v0  ;;  %v5885_v63 = vld [vmem:[%s8179_s1 + $0x718] ss:$28 sps:$4 sm:$0xff]   ;;  %v5889_v0 = vld [vmem:[%s8179_s1 + $0x910] ss:$28 sps:$4 sm:$0xff]  }
  0xe6   :  { %5315 = vmatprep.subr.bf16.mxu1 %v5819_v51  ;;  %v5866_v51 = vld [vmem:[%s8179_s1 + $0x518] ss:$28 sps:$4 sm:$0xff]  }
  0xe8   :  { %2585 = vmatpush1.bf16.msra.mxu0 %v5795_v2  ;;  %v5873_v2 = vld [vmem:[%s8179_s1 + $0x554] ss:$28 sps:$4 sm:$0xff]  }
  0xe9   :  { %2586 = vmatprep.subr.bf16.mxu0 %v5803_v3  ;;  %5316 = vmatpush3.bf16.msra.mxu1 %v5820_v4  ;;  %v5890_v3 = vld [vmem:[%s8179_s1 + $0x750] ss:$28 sps:$4 sm:$0xff]  }
  0xea   :  { %5317 = vmatprep.subr.bf16.mxu1 %v5824_v5  ;;  %v5871_v4 = vld [vmem:[%s8179_s1 + $0x550] ss:$28 sps:$4 sm:$0xff]   ;;  %v5894_v5 = vld [vmem:[%s8179_s1 + $0x948] ss:$28 sps:$4 sm:$0xff]  }
  0xec   :  { %2587 = vmatpush1.bf16.msra.mxu0 %v5801_v6  ;;  %v5878_v6 = vld [vmem:[%s8179_s1 + $0x58c] ss:$28 sps:$4 sm:$0xff]  }
  0xed   :  { %2588 = vmatprep.subr.bf16.mxu0 %v5808_v7  ;;  %5318 = vmatpush3.bf16.msra.mxu1 %v5825_v8  ;;  %v5895_v7 = vld [vmem:[%s8179_s1 + $0x788] ss:$28 sps:$4 sm:$0xff]  }
  0xee   :  { %5319 = vmatprep.subr.bf16.mxu1 %v5829_v11  ;;  %v5876_v8 = vld [vmem:[%s8179_s1 + $0x588] ss:$28 sps:$4 sm:$0xff]   ;;  %v5899_v11 = vld [vmem:[%s8179_s1 + $0x980] ss:$28 sps:$4 sm:$0xff]  }
  0xf0   :  { %2589 = vmatpush1.bf16.msra.mxu0 %v5806_v12  ;;  %v5883_v12 = vld [vmem:[%s8179_s1 + $0x5c4] ss:$28 sps:$4 sm:$0xff]  }
  0xf1   :  { %2590 = vmatprep.subr.bf16.mxu0 %v5813_v13  ;;  %5320 = vmatpush3.bf16.msra.mxu1 %v5830_v14  ;;  %v5900_v13 = vld [vmem:[%s8179_s1 + $0x7c0] ss:$28 sps:$4 sm:$0xff]   ;;  %v5904_v14 = vld [vmem:[%s8179_s1 + $0x9b8] ss:$28 sps:$4 sm:$0xff]  }
  0xf2   :  { %5321 = vmatprep.subr.bf16.mxu1 %v5834_v15  ;;  %v5881_v15 = vld [vmem:[%s8179_s1 + $0x5c0] ss:$28 sps:$4 sm:$0xff]  }
  0xf4   :  { %2591 = vmatpush1.bf16.msra.mxu0 %v5811_v16  ;;  %v5888_v16 = vld [vmem:[%s8179_s1 + $0x5fc] ss:$28 sps:$4 sm:$0xff]  }
  0xf5   :  { %2592 = vmatprep.subr.bf16.mxu0 %v5818_v17  ;;  %5322 = vmatpush3.bf16.msra.mxu1 %v5835_v19  ;;  %v5905_v17 = vld [vmem:[%s8179_s1 + $0x7f8] ss:$28 sps:$4 sm:$0xff]   ;;  %v5909_v19 = vld [vmem:[%s8179_s1 + $0x9f0] ss:$28 sps:$4 sm:$0xff]  }
  0xf6   :  { %5323 = vmatprep.subr.bf16.mxu1 %v5839_v20  ;;  %v5886_v20 = vld [vmem:[%s8179_s1 + $0x5f8] ss:$28 sps:$4 sm:$0xff]  }
  0xf8   :  { %2593 = vmatpush1.bf16.msra.mxu0 %v5816_v21  ;;  %v5893_v21 = vld [vmem:[%s8179_s1 + $0x634] ss:$28 sps:$4 sm:$0xff]  }
  0xf9   :  { %2594 = vmatprep.subr.bf16.mxu0 %v5823_v22  ;;  %5324 = vmatpush3.bf16.msra.mxu1 %v5840_v23  ;;  %v5910_v22 = vld [vmem:[%s8179_s1 + $0x830] ss:$28 sps:$4 sm:$0xff]   ;;  %v5914_v23 = vld [vmem:[%s8179_s1 + $0xa28] ss:$28 sps:$4 sm:$0xff]  }
  0xfa   :  { %5331 = vmatprep.subr.bf16.mxu1 %v5844_v25  ;;  %v5891_v25 = vld [vmem:[%s8179_s1 + $0x630] ss:$28 sps:$4 sm:$0xff]  }
  0xfc   :  { %2595 = vmatpush1.bf16.msra.mxu0 %v5821_v26  ;;  %2763 = vmatmul.mubr.bf16.vlgmr.msra.gmra.mrb[12].mxu1 %v6542_v9  ;;  %v5898_v26 = vld [vmem:[%s8179_s1 + $0x66c] ss:$28 sps:$4 sm:$0xff]  }
  0xfd   :  { %2596 = vmatprep.subr.bf16.mxu0 %v5828_v27  ;;  %5332 = vmatpush3.bf16.msra.mxu1 %v5845_v28  ;;  %v5915_v27 = vld [vmem:[%s8179_s1 + $0x868] ss:$28 sps:$4 sm:$0xff]  }
  0xfe   :  { %5333 = vmatprep.subr.bf16.mxu1 %v5849_v30  ;;  %2802 = vmatprep.mubr.bf16.mxu1 %v6621_v36  ;;  %v5896_v28 = vld [vmem:[%s8179_s1 + $0x668] ss:$28 sps:$4 sm:$0xff]   ;;  %v5919_v30 = vld [vmem:[%s8179_s1 + $0xa60] ss:$28 sps:$4 sm:$0xff]  }
 0x100   :  { %2597 = vmatpush1.bf16.msra.mxu0 %v5826_v31  ;;  %v5903_v31 = vld [vmem:[%s8179_s1 + $0x6a4] ss:$28 sps:$4 sm:$0xff]  }
 0x101   :  { %2607 = vmatprep.subr.bf16.mxu0 %v5833_v32  ;;  %5334 = vmatpush3.bf16.msra.mxu1 %v5850_v33  ;;  %v5920_v32 = vld [vmem:[%s8179_s1 + $0x8a0] ss:$28 sps:$4 sm:$0xff]  }
 0x102   :  { %5335 = vmatprep.subr.bf16.mxu1 %v5854_v34  ;;  %v5901_v33 = vld [vmem:[%s8179_s1 + $0x6a0] ss:$28 sps:$4 sm:$0xff]  }
 0x103   :  { %2599 = vmatmul.mubr.bf16.vlgmr.msra.gmra.mrb[4].mxu0 %v6542_v9  ;;  %v5864_v9 = vld [vmem:[%s8179_s1 + $0x638] ss:$28 sps:$4 sm:$0xff]  }
 0x104   :  { %2608 = vmatpush1.bf16.msra.mxu0 %v5831_v35  ;;  %2639 = vmatprep.mubr.bf16.mxu0 %v6621_v36  ;;  %v5841_v36 = vld [vmem:[%s8179_s1 + $0x400] ss:$28 sps:$4 sm:$0xff]   ;;  %v5927_v35 = vld [vmem:[%s8179_s1 + $0xa98] ss:$28 sps:$4 sm:$0xff]  }
 0x105   :  { %2609 = vmatprep.subr.bf16.mxu0 %v5838_v37  ;;  %5336 = vmatpush3.bf16.msra.mxu1 %v5855_v38  ;;  %v5908_v34 = vld [vmem:[%s8179_s1 + $0x6dc] ss:$28 sps:$4 sm:$0xff]   ;;  %v6284_v38 = vmov 0.0  }
 0x106   :  { %5337 = vmatprep.subr.bf16.mxu1 %v5859_v39  ;;  %v5906_v37 = vld [vmem:[%s8179_s1 + $0x6d8] ss:$28 sps:$4 sm:$0xff]  }
 0x107   :  { %v5942_v39 = vld [vmem:[%s8181_s3 + $0x4] ss:$16 sps:$4 sm:$0xff]  }
 0x108   :  { %2610 = vmatpush1.bf16.msra.mxu0 %v5836_v40  ;;  %v5913_v40 = vld [vmem:[%s8179_s1 + $0x714] ss:$28 sps:$4 sm:$0xff]  }
 0x109   :  { %2611 = vmatprep.subr.bf16.mxu0 %v5843_v41  ;;  %5338 = vmatpush3.bf16.msra.mxu1 %v5860_v42  ;;  %v5911_v41 = vld [vmem:[%s8179_s1 + $0x710] ss:$28 sps:$4 sm:$0xff]  }
 0x10a   :  { %5339 = vmatprep.subr.bf16.mxu1 %v5864_v9  ;;  %v5918_v42 = vld [vmem:[%s8179_s1 + $0x74c] ss:$28 sps:$4 sm:$0xff]   ;;  %v5940_v9 = vld [vmem:[%s8181_s3] ss:$16 sps:$4 sm:$0xff]  }
 0x10c   :  { %2612 = vmatpush1.bf16.msra.mxu0 %v5841_v36  ;;  %v5948_v36 = vld [vmem:[%s8181_s3 + $0x24] ss:$16 sps:$4 sm:$0xff]  }
 0x10d   :  { %2613 = vmatprep.subr.bf16.mxu0 %v5848_v43  ;;  %5340 = vmatpush3.bf16.msra.mxu1 %v5865_v44  ;;  %v5916_v43 = vld [vmem:[%s8179_s1 + $0x748] ss:$28 sps:$4 sm:$0xff]  }
 0x10e   :  { %5341 = vmatprep.subr.bf16.mxu1 %v5869_v45  ;;  %v5923_v44 = vld [vmem:[%s8179_s1 + $0x784] ss:$28 sps:$4 sm:$0xff]  }
 0x10f   :  { %v5946_v45 = vld [vmem:[%s8181_s3 + $0x20] ss:$16 sps:$4 sm:$0xff]  }
 0x110   :  { %2614 = vmatpush1.bf16.msra.mxu0 %v5846_v46  ;;  %v5954_v46 = vld [vmem:[%s8181_s3 + $0x44] ss:$16 sps:$4 sm:$0xff]  }
 0x111   :  { %2615 = vmatprep.subr.bf16.mxu0 %v5853_v47  ;;  %5342 = vmatpush3.bf16.msra.mxu1 %v5870_v48  ;;  %v5926_v47 = vld [vmem:[%s8179_s1 + $0x7bc] ss:$28 sps:$4 sm:$0xff]  }
 0x112   :  { %5343 = vmatprep.subr.bf16.mxu1 %v5874_v49  ;;  %v5924_v48 = vld [vmem:[%s8179_s1 + $0x7b8] ss:$28 sps:$4 sm:$0xff]  }
 0x113   :  { %v5930_v49 = vld [vmem:[%s8179_s1 + $0x7f4] ss:$28 sps:$4 sm:$0xff]  }
 0x114   :  { %2616 = vmatpush1.bf16.msra.mxu0 %v5851_v50  ;;  %v5958_v50 = vld [vmem:[%s8181_s3 + $0x60] ss:$16 sps:$4 sm:$0xff]  }
 0x115   :  { %2617 = vmatprep.subr.bf16.mxu0 %v5858_v52  ;;  %5344 = vmatpush3.bf16.msra.mxu1 %v5875_v53  ;;  %v5928_v52 = vld [vmem:[%s8179_s1 + $0x7f0] ss:$28 sps:$4 sm:$0xff]   ;;  %v5966_v53 = vld [vmem:[%s8181_s3 + $0x84] ss:$16 sps:$4 sm:$0xff]  }
 0x116   :  { %5345 = vmatprep.subr.bf16.mxu1 %v5879_v54  ;;  %v5933_v54 = vld [vmem:[%s8179_s1 + $0x82c] ss:$28 sps:$4 sm:$0xff]  }
 0x118   :  { %2618 = vmatpush1.bf16.msra.mxu0 %v5856_v56  ;;  %v5964_v56 = vld [vmem:[%s8181_s3 + $0x80] ss:$16 sps:$4 sm:$0xff]  }
 0x119   :  { %2619 = vmatprep.subr.bf16.mxu0 %v5863_v58  ;;  %5346 = vmatpush3.bf16.msra.mxu1 %v5880_v59  ;;  %v5931_v58 = vld [vmem:[%s8179_s1 + $0x828] ss:$28 sps:$4 sm:$0xff]  }
 0x11a   :  { %5353 = vmatprep.subr.bf16.mxu1 %v5884_v60  ;;  %v5972_v59 = vld [vmem:[%s8181_s3 + $0xa4] ss:$16 sps:$4 sm:$0xff]  }
 0x11b   :  { %v5936_v60 = vld [vmem:[%s8179_s1 + $0x864] ss:$28 sps:$4 sm:$0xff]  }
 0x11c   :  { %2620 = vmatpush1.bf16.msra.mxu0 %v5861_v61  ;;  %2803 = vmatmul.mubr.bf16.vlgmr.msra.gmra.mrb[16].mxu1 %v6748_v18  ;;  %v5970_v61 = vld [vmem:[%s8181_s3 + $0xa0] ss:$16 sps:$4 sm:$0xff]  }
 0x11d   :  { %2621 = vmatprep.subr.bf16.mxu0 %v5868_v62  ;;  %5354 = vmatpush3.bf16.msra.mxu1 %v5885_v63  ;;  %v5934_v62 = vld [vmem:[%s8179_s1 + $0x860] ss:$28 sps:$4 sm:$0xff]   ;;  %v5978_v63 = vld [vmem:[%s8181_s3 + $0xc4] ss:$16 sps:$4 sm:$0xff]  }
 0x11e   :  { %5355 = vmatprep.subr.bf16.mxu1 %v5889_v0  ;;  %2842 = vmatprep.mubr.bf16.mxu1 %v6765_v24  ;;  %v5939_v0 = vld [vmem:[%s8179_s1 + $0x89c] ss:$28 sps:$4 sm:$0xff]  }
 0x120   :  { %2622 = vmatpush1.bf16.msra.mxu0 %v5866_v51  ;;  %v5976_v51 = vld [vmem:[%s8181_s3 + $0xc0] ss:$16 sps:$4 sm:$0xff]  }
 0x121   :  { %2623 = vmatprep.subr.bf16.mxu0 %v5873_v2  ;;  %5356 = vmatpush3.bf16.msra.mxu1 %v5890_v3  ;;  %v5937_v2 = vld [vmem:[%s8179_s1 + $0x898] ss:$28 sps:$4 sm:$0xff]  }
 0x122   :  { %5357 = vmatprep.subr.bf16.mxu1 %v5894_v5  ;;  %v5984_v3 = vld [vmem:[%s8181_s3 + $0xe4] ss:$16 sps:$4 sm:$0xff]   ;;  %v5982_v5 = vld [vmem:[%s8181_s3 + $0xe0] ss:$16 sps:$4 sm:$0xff]  }
 0x124   :  { %2624 = vmatpush1.bf16.msra.mxu0 %v5871_v4  ;;  %v5945_v4 = vld [vmem:[%s8179_s1 + $0x8d4] ss:$28 sps:$4 sm:$0xff]  }
 0x125   :  { %2625 = vmatprep.subr.bf16.mxu0 %v5878_v6  ;;  %5358 = vmatpush3.bf16.msra.mxu1 %v5895_v7  ;;  %v5990_v6 = vld [vmem:[%s8181_s3 + $0x104] ss:$16 sps:$4 sm:$0xff]   ;;  %v5943_v7 = vld [vmem:[%s8179_s1 + $0x8d0] ss:$28 sps:$4 sm:$0xff]  }
 0x126   :  { %5359 = vmatprep.subr.bf16.mxu1 %v5899_v11  ;;  %v5988_v11 = vld [vmem:[%s8181_s3 + $0x100] ss:$16 sps:$4 sm:$0xff]  }
 0x128   :  { %2626 = vmatpush1.bf16.msra.mxu0 %v5876_v8  ;;  %v5951_v8 = vld [vmem:[%s8179_s1 + $0x90c] ss:$28 sps:$4 sm:$0xff]  }
 0x129   :  { %2627 = vmatprep.subr.bf16.mxu0 %v5883_v12  ;;  %5360 = vmatpush3.bf16.msra.mxu1 %v5900_v13  ;;  %v5996_v12 = vld [vmem:[%s8181_s3 + $0x124] ss:$16 sps:$4 sm:$0xff]  }
 0x12a   :  { %5361 = vmatprep.subr.bf16.mxu1 %v5904_v14  ;;  %v5949_v13 = vld [vmem:[%s8179_s1 + $0x908] ss:$28 sps:$4 sm:$0xff]  }
 0x12b   :  { %v5957_v14 = vld [vmem:[%s8179_s1 + $0x944] ss:$28 sps:$4 sm:$0xff]  }
 0x12c   :  { %2628 = vmatpush1.bf16.msra.mxu0 %v5881_v15  ;;  %v5994_v15 = vld [vmem:[%s8181_s3 + $0x120] ss:$16 sps:$4 sm:$0xff]  }
 0x12d   :  { %2629 = vmatprep.subr.bf16.mxu0 %v5888_v16  ;;  %5362 = vmatpush3.bf16.msra.mxu1 %v5905_v17  ;;  %v6002_v16 = vld [vmem:[%s8181_s3 + $0x144] ss:$16 sps:$4 sm:$0xff]   ;;  %v5955_v17 = vld [vmem:[%s8179_s1 + $0x940] ss:$28 sps:$4 sm:$0xff]  }
 0x12e   :  { %5363 = vmatprep.subr.bf16.mxu1 %v5909_v19  ;;  %v5963_v19 = vld [vmem:[%s8179_s1 + $0x97c] ss:$28 sps:$4 sm:$0xff]  }
 0x130   :  { %2630 = vmatpush1.bf16.msra.mxu0 %v5886_v20  ;;  %v6000_v20 = vld [vmem:[%s8181_s3 + $0x140] ss:$16 sps:$4 sm:$0xff]  }
 0x131   :  { %2631 = vmatprep.subr.bf16.mxu0 %v5893_v21  ;;  %5364 = vmatpush3.bf16.msra.mxu1 %v5910_v22  ;;  %v6008_v21 = vld [vmem:[%s8181_s3 + $0x164] ss:$16 sps:$4 sm:$0xff]  }
 0x132   :  { %5365 = vmatprep.subr.bf16.mxu1 %v5914_v23  ;;  %v5961_v22 = vld [vmem:[%s8179_s1 + $0x978] ss:$28 sps:$4 sm:$0xff]  }
 0x133   :  { %v5969_v23 = vld [vmem:[%s8179_s1 + $0x9b4] ss:$28 sps:$4 sm:$0xff]  }
 0x134   :  { %2632 = vmatpush1.bf16.msra.mxu0 %v5891_v25  ;;  %v6006_v25 = vld [vmem:[%s8181_s3 + $0x160] ss:$16 sps:$4 sm:$0xff]  }
 0x135   :  { %2633 = vmatprep.subr.bf16.mxu0 %v5898_v26  ;;  %5366 = vmatpush3.bf16.msra.mxu1 %v5915_v27  ;;  %v6014_v26 = vld [vmem:[%s8181_s3 + $0x184] ss:$16 sps:$4 sm:$0xff]   ;;  %v5967_v27 = vld [vmem:[%s8179_s1 + $0x9b0] ss:$28 sps:$4 sm:$0xff]  }
 0x136   :  { %5367 = vmatprep.subr.bf16.mxu1 %v5919_v30  ;;  %v6012_v30 = vld [vmem:[%s8181_s3 + $0x180] ss:$16 sps:$4 sm:$0xff]  }
 0x138   :  { %2634 = vmatpush1.bf16.msra.mxu0 %v5896_v28  ;;  %v5975_v28 = vld [vmem:[%s8179_s1 + $0x9ec] ss:$28 sps:$4 sm:$0xff]  }
 0x139   :  { %2635 = vmatprep.subr.bf16.mxu0 %v5903_v31  ;;  %5368 = vmatpush3.bf16.msra.mxu1 %v5920_v32  ;;  %v6020_v31 = vld [vmem:[%s8181_s3 + $0x1a4] ss:$16 sps:$4 sm:$0xff]  }
 0x13a   :  { %5399 = vmatprep.subr.bf16.mxu1 %v6284_v38  ;;  %v5973_v32 = vld [vmem:[%s8179_s1 + $0x9e8] ss:$28 sps:$4 sm:$0xff]  }
 0x13c   :  { %2636 = vmatpush1.bf16.msra.mxu0 %v5901_v33  ;;  %2843 = vmatmul.mubr.bf16.vlgmr.msra.gmra.mrb[20].mxu1 %v6954_v29  ;;  %v5981_v33 = vld [vmem:[%s8179_s1 + $0xa24] ss:$28 sps:$4 sm:$0xff]  }
 0x13d   :  { %2637 = vmatprep.subr.bf16.mxu0 %v5908_v34  ;;  %5400 = vmatpush3.bf16.msra.mxu1 %v5927_v35  ;;  %v6018_v34 = vld [vmem:[%s8181_s3 + $0x1a0] ss:$16 sps:$4 sm:$0xff]   ;;  %v6026_v35 = vld [vmem:[%s8181_s3 + $0x1c4] ss:$16 sps:$4 sm:$0xff]  }
 0x13e   :  { %5401 = vmatprep.mubr.msk.bf16.mxu1 %vm6285_vm1, %v6284_v38  ;;  %4105 = vmatprep.subr.bf16.mxu1 %v5942_v39  ;;  %v5987_v38 = vld [vmem:[%s8179_s1 + $0xa5c] ss:$28 sps:$4 sm:$0xff]   ;;  %v6024_v39 = vld [vmem:[%s8181_s3 + $0x1c0] ss:$16 sps:$4 sm:$0xff]  }
 0x140   :  { %2638 = vmatpush1.bf16.msra.mxu0 %v5906_v37  ;;  %v5979_v37 = vld [vmem:[%s8179_s1 + $0xa20] ss:$28 sps:$4 sm:$0xff]  }
 0x141   :  { %2648 = vmatprep.subr.bf16.mxu0 %v5913_v40  ;;  %v6032_v40 = vld [vmem:[%s8181_s3 + $0x1e4] ss:$16 sps:$4 sm:$0xff]  }
 0x143   :  { %2640 = vmatmul.mubr.bf16.vlgmr.msra.gmra.mrb[4].mxu0 %v6748_v18  ;;  %v5921_v18 = vld [vmem:[%s8179_s1 + $0x780] ss:$28 sps:$4 sm:$0xff]  }
 0x144   :  { %2649 = vmatpush1.bf16.msra.mxu0 %v5911_v41  ;;  %5402 = vmatmul.mubr.msk.bf16.vlgmr.msra.gmra.mrb[24].mxu1 %vm2234_vm0, %v6354_v10  ;;  %v5952_v10 = vld [vmem:[%s8181_s3 + $0x40] ss:$16 sps:$4 sm:$0xff]   ;;  %v5985_v41 = vld [vmem:[%s8179_s1 + $0xa58] ss:$28 sps:$4 sm:$0xff]  }
 0x145   :  { %2650 = vmatprep.subr.bf16.mxu0 %v5918_v42  ;;  %4106 = vmatpush1.bf16.msra.mxu1 %v5940_v9  ;;  %v5993_v42 = vld [vmem:[%s8181_s3 + $0xc] ss:$16 sps:$4 sm:$0xff]   ;;  %v6030_v9 = vld [vmem:[%s8181_s3 + $0x1e0] ss:$16 sps:$4 sm:$0xff]  }
 0x146   :  { %4107 = vmatprep.subr.bf16.mxu1 %v5948_v36  ;;  %2680 = vmatprep.mubr.bf16.mxu0 %v6765_v24  ;;  %v5960_v24 = vld [vmem:[%s8181_s3 + $0x64] ss:$16 sps:$4 sm:$0xff]  }
 0x147   :  { %v6038_v36 = vld [vmem:[%s8181_s3 + $0x204] ss:$16 sps:$4 sm:$0xff]  }
 0x148   :  { %2651 = vmatpush1.bf16.msra.mxu0 %v5916_v43  ;;  %v5991_v43 = vld [vmem:[%s8181_s3 + $0x8] ss:$16 sps:$4 sm:$0xff]  }
 0x149   :  { %2652 = vmatprep.subr.bf16.mxu0 %v5923_v44  ;;  %4108 = vmatpush1.bf16.msra.mxu1 %v5946_v45  ;;  %v5999_v44 = vld [vmem:[%s8181_s3 + $0x2c] ss:$16 sps:$4 sm:$0xff]   ;;  %v5997_v45 = vld [vmem:[%s8181_s3 + $0x28] ss:$16 sps:$4 sm:$0xff]  }
 0x14a   :  { %4109 = vmatprep.subr.bf16.mxu1 %v5954_v46  ;;  %v435_v46 = vlaneseq }
 0x14c   :  { %2653 = vmatpush1.bf16.msra.mxu0 %v5921_v18  ;;  %v6005_v18 = vld [vmem:[%s8181_s3 + $0x4c] ss:$16 sps:$4 sm:$0xff]  }
 0x14d   :  { %2654 = vmatprep.subr.bf16.mxu0 %v5926_v47  ;;  %4110 = vmatpush1.bf16.msra.mxu1 %v5952_v10  ;;  %v6003_v47 = vld [vmem:[%s8181_s3 + $0x48] ss:$16 sps:$4 sm:$0xff]   ;;  %v7549_v10 = vshrl.u32 %v435_v46, 7  ;;  %v6066_v46 = vld [vmem:[%s8181_s3 + $0x2a0] ss:$16 sps:$4 sm:$0xff]  }
 0x14e   :  { %4111 = vmatprep.subr.bf16.mxu1 %v5960_v24  ;;  %v6017_v24 = vld [vmem:[%s8181_s3 + $0x8c] ss:$16 sps:$4 sm:$0xff]  }
 0x150   :  { %2655 = vmatpush1.bf16.msra.mxu0 %v5924_v48  ;;  %v6009_v48 = vld [vmem:[%s8181_s3 + $0x68] ss:$16 sps:$4 sm:$0xff]  }
 0x151   :  { %2656 = vmatprep.subr.bf16.mxu0 %v5930_v49  ;;  %4112 = vmatpush1.bf16.msra.mxu1 %v5958_v50  ;;  %v437_v49 = vsub.s32 0, %v7549_v10  ;;  %v6015_v50 = vld [vmem:[%s8181_s3 + $0x88] ss:$16 sps:$4 sm:$0xff]  }
 0x152   :  { %4113 = vmatprep.subr.bf16.mxu1 %v5966_v53  ;;  %v441_v53 = vsub.s32 1, %v7549_v10 }
 0x154   :  { %2657 = vmatpush1.bf16.msra.mxu0 %v5928_v52  ;;  %v7564_v52 = vld [vmem:[%s8182_s2] sm:$0x7f] }
 0x155   :  { %2658 = vmatprep.subr.bf16.mxu0 %v5933_v54  ;;  %4114 = vmatpush1.bf16.msra.mxu1 %v5964_v56  ;;  %v6023_v54 = vld [vmem:[%s8181_s3 + $0xac] ss:$16 sps:$4 sm:$0xff]   ;;  %v438_v56 = vrot.slane %v7564_v52, %v437_v49 }
 0x156   :  { %4115 = vmatprep.subr.bf16.mxu1 %v5972_v59  ;;  %v6021_v59 = vld [vmem:[%s8181_s3 + $0xa8] ss:$16 sps:$4 sm:$0xff]  }
 0x158   :  { %2659 = vmatpush1.bf16.msra.mxu0 %v5931_v58  ;;  %v442_v58 = vrot.slane %v7564_v52, %v441_v53 }
 0x159   :  { %2660 = vmatprep.subr.bf16.mxu0 %v5936_v60  ;;  %4116 = vmatpush1.bf16.msra.mxu1 %v5970_v61  ;;  %v6029_v60 = vld [vmem:[%s8181_s3 + $0xcc] ss:$16 sps:$4 sm:$0xff]  }
 0x15a   :  { %4117 = vmatprep.subr.bf16.mxu1 %v5978_v63 }
 0x15c   :  { %2661 = vmatpush1.bf16.msra.mxu0 %v5934_v62 }
 0x15d   :  { %2662 = vmatprep.subr.bf16.mxu0 %v5939_v0  ;;  %4118 = vmatpush1.bf16.msra.mxu1 %v5976_v51 }
 0x15e   :  { %4119 = vmatprep.subr.bf16.mxu1 %v5984_v3 }
 0x160   :  { %2663 = vmatpush1.bf16.msra.mxu0 %v5937_v2  ;;  %v6027_v2 = vld [vmem:[%s8181_s3 + $0xc8] ss:$16 sps:$4 sm:$0xff]  }
 0x161   :  { %2664 = vmatprep.subr.bf16.mxu0 %v5945_v4  ;;  %4120 = vmatpush1.bf16.msra.mxu1 %v5982_v5  ;;  %v6035_v5 = vld [vmem:[%s8181_s3 + $0xec] ss:$16 sps:$4 sm:$0xff]  }
 0x162   :  { %4121 = vmatprep.subr.bf16.mxu1 %v5990_v6 }
 0x164   :  { %2665 = vmatpush1.bf16.msra.mxu0 %v5943_v7 }
 0x165   :  { %2666 = vmatprep.subr.bf16.mxu0 %v5951_v8  ;;  %4122 = vmatpush1.bf16.msra.mxu1 %v5988_v11  ;;  %v6033_v11 = vld [vmem:[%s8181_s3 + $0xe8] ss:$16 sps:$4 sm:$0xff]  }
 0x166   :  { %4123 = vmatprep.subr.bf16.mxu1 %v5996_v12 }
 0x168   :  { %2667 = vmatpush1.bf16.msra.mxu0 %v5949_v13  ;;  %v6041_v13 = vld [vmem:[%s8181_s3 + $0x10c] ss:$16 sps:$4 sm:$0xff]  }
 0x169   :  { %2668 = vmatprep.subr.bf16.mxu0 %v5957_v14  ;;  %4124 = vmatpush1.bf16.msra.mxu1 %v5994_v15  ;;  %v6039_v15 = vld [vmem:[%s8181_s3 + $0x108] ss:$16 sps:$4 sm:$0xff]  }
 0x16a   :  { %4125 = vmatprep.subr.bf16.mxu1 %v6002_v16  ;;  %v449_v16 = vsub.s32 3, %v7549_v10 }
 0x16c   :  { %2669 = vmatpush1.bf16.msra.mxu0 %v5955_v17  ;;  %v6047_v17 = vld [vmem:[%s8181_s3 + $0x12c] ss:$16 sps:$4 sm:$0xff]  }
 0x16d   :  { %2670 = vmatprep.subr.bf16.mxu0 %v5963_v19  ;;  %4126 = vmatpush1.bf16.msra.mxu1 %v6000_v20  ;;  %v6042_v19 = vld [vmem:[%s8181_s3 + $0x220] ss:$16 sps:$4 sm:$0xff]   ;;  %v6050_v20 = vld [vmem:[%s8181_s3 + $0x244] ss:$16 sps:$4 sm:$0xff]  }
 0x16e   :  { %4127 = vmatprep.subr.bf16.mxu1 %v6008_v21  ;;  %v6045_v21 = vld [vmem:[%s8181_s3 + $0x128] ss:$16 sps:$4 sm:$0xff]  }
 0x170   :  { %2671 = vmatpush1.bf16.msra.mxu0 %v5961_v22  ;;  %v450_v22 = vrot.slane %v7564_v52, %v449_v16 }
 0x171   :  { %2672 = vmatprep.subr.bf16.mxu0 %v5969_v23  ;;  %4128 = vmatpush1.bf16.msra.mxu1 %v6006_v25  ;;  %v6053_v23 = vld [vmem:[%s8181_s3 + $0x14c] ss:$16 sps:$4 sm:$0xff]   ;;  %v6048_v25 = vld [vmem:[%s8181_s3 + $0x240] ss:$16 sps:$4 sm:$0xff]  }
 0x172   :  { %4129 = vmatprep.subr.bf16.mxu1 %v6014_v26 }
 0x174   :  { %2673 = vmatpush1.bf16.msra.mxu0 %v5967_v27  ;;  %v6056_v27 = vld [vmem:[%s8181_s3 + $0x264] ss:$16 sps:$4 sm:$0xff]  }
 0x175   :  { %2674 = vmatprep.subr.bf16.mxu0 %v5975_v28  ;;  %4130 = vmatpush1.bf16.msra.mxu1 %v6012_v30  ;;  %v6051_v30 = vld [vmem:[%s8181_s3 + $0x148] ss:$16 sps:$4 sm:$0xff]  }
 0x176   :  { %4131 = vmatprep.subr.bf16.mxu1 %v6020_v31 }
 0x178   :  { %2675 = vmatpush1.bf16.msra.mxu0 %v5973_v32 }
 0x179   :  { %2676 = vmatprep.subr.bf16.mxu0 %v5981_v33  ;;  %4132 = vmatpush1.bf16.msra.mxu1 %v6018_v34  ;;  %v6059_v33 = vld [vmem:[%s8181_s3 + $0x16c] ss:$16 sps:$4 sm:$0xff]  }
 0x17a   :  { %4133 = vmatprep.subr.bf16.mxu1 %v6026_v35  ;;  %v6054_v35 = vld [vmem:[%s8181_s3 + $0x260] ss:$16 sps:$4 sm:$0xff]  }
 0x17c   :  { %2677 = vmatpush1.bf16.msra.mxu0 %v5979_v37 }
 0x17d   :  { %2678 = vmatprep.subr.bf16.mxu0 %v5987_v38  ;;  %4134 = vmatpush1.bf16.msra.mxu1 %v6024_v39  ;;  %v6062_v38 = vld [vmem:[%s8181_s3 + $0x284] ss:$16 sps:$4 sm:$0xff]   ;;  %v6057_v39 = vld [vmem:[%s8181_s3 + $0x168] ss:$16 sps:$4 sm:$0xff]  }
 0x17e   :  { %4135 = vmatprep.subr.bf16.mxu1 %v6032_v40 }
 0x180   :  { %2679 = vmatpush1.bf16.msra.mxu0 %v5985_v41  ;;  %v6065_v41 = vld [vmem:[%s8181_s3 + $0x18c] ss:$16 sps:$4 sm:$0xff]  }
 0x181   :  { %4269 = vmatprep.subr.bf16.mxu0 %v5993_v42  ;;  %4136 = vmatpush1.bf16.msra.mxu1 %v6030_v9  ;;  %v6060_v42 = vld [vmem:[%s8181_s3 + $0x280] ss:$16 sps:$4 sm:$0xff]   ;;  %v6068_v9 = vld [vmem:[%s8181_s3 + $0x2a4] ss:$16 sps:$4 sm:$0xff]  }
 0x182   :  { %4146 = vmatprep.subr.bf16.mxu1 %v6038_v36 }
 0x183   :  { %2681 = vmatmul.mubr.bf16.vlgmr.msra.gmra.mrb[4].mxu0 %v6954_v29  ;;  %v6011_v29 = vld [vmem:[%s8181_s3 + $0x6c] ss:$16 sps:$4 sm:$0xff]  }
 0x184   :  { %4270 = vmatpush1.bf16.msra.mxu0 %v5991_v43  ;;  %v6063_v43 = vld [vmem:[%s8181_s3 + $0x188] ss:$16 sps:$4 sm:$0xff]  }
 0x185   :  { %4271 = vmatprep.subr.bf16.mxu0 %v5999_v44 }
 0x188   :  { %4272 = vmatpush1.bf16.msra.mxu0 %v5997_v45  ;;  %v6071_v45 = vld [vmem:[%s8181_s3 + $0x1ac] ss:$16 sps:$4 sm:$0xff]  }
 0x189   :  { %4273 = vmatprep.subr.bf16.mxu0 %v6005_v18 }
 0x18c   :  { %4274 = vmatpush1.bf16.msra.mxu0 %v6003_v47 }
 0x18d   :  { %4275 = vmatprep.subr.bf16.mxu0 %v6011_v29  ;;  %v6074_v29 = vld [vmem:[%s8181_s3 + $0x2c4] ss:$16 sps:$4 sm:$0xff]  }
 0x190   :  { %4276 = vmatpush1.bf16.msra.mxu0 %v6009_v48  ;;  %v6069_v48 = vld [vmem:[%s8181_s3 + $0x1a8] ss:$16 sps:$4 sm:$0xff]  }
 0x191   :  { %4277 = vmatprep.subr.bf16.mxu0 %v6017_v24  ;;  %v6077_v24 = vld [vmem:[%s8181_s3 + $0x1cc] ss:$16 sps:$4 sm:$0xff]  }
 0x194   :  { %4278 = vmatpush1.bf16.msra.mxu0 %v6015_v50  ;;  %v6072_v50 = vld [vmem:[%s8181_s3 + $0x2c0] ss:$16 sps:$4 sm:$0xff]  }
 0x195   :  { %4279 = vmatprep.subr.bf16.mxu0 %v6023_v54  ;;  %v6080_v54 = vld [vmem:[%s8181_s3 + $0x2e4] ss:$16 sps:$4 sm:$0xff]  }
 0x196   :  { %v2354_v61 = vpop.f32.mrb[0].mxu0 }
 0x197   :  { %v5405_v62 = vadd.f32 %v2354_v61, %v438_v56  ;;  %v2356_v63 = vpop.f32.mrb[1].mxu0  ;;  %v6075_v56 = vld [vmem:[%s8181_s3 + $0x1c8] ss:$16 sps:$4 sm:$0xff]  }
 0x198   :  { %v5407_v0 = vadd.f32 %v2356_v63, %v442_v58  ;;  %v2358_v51 = vpop.f32.mrb[2].mxu0  ;;  %4280 = vmatpush1.bf16.msra.mxu0 %v6021_v59  ;;  %v6083_v58 = vld [vmem:[%s8181_s3 + $0x1ec] ss:$16 sps:$4 sm:$0xff]   ;;  %v6078_v59 = vld [vmem:[%s8181_s3 + $0x2e0] ss:$16 sps:$4 sm:$0xff]  }
 0x199   :  { %v5406_v3 = vadd.f32 %v5405_v62, %v7032_v55  ;;  %v2359_v4 = vpop.f32.mrb[3].mxu0  ;;  %4281 = vmatprep.subr.bf16.mxu0 %v6029_v60  ;;  %v6036_v55 = vld [vmem:[%s8181_s3 + $0x200] ss:$16 sps:$4 sm:$0xff]   ;;  %v6086_v60 = vld [vmem:[%s8181_s3 + $0x304] ss:$16 sps:$4 sm:$0xff]  }
 0x19a   :  { %v5408_v6 = vadd.f32 %v5407_v0, %v7039_v57  ;;  %v6044_v57 = vld [vmem:[%s8181_s3 + $0x224] ss:$16 sps:$4 sm:$0xff]   ;;  %v6081_v61 = vld [vmem:[%s8181_s3 + $0x1e8] ss:$16 sps:$4 sm:$0xff]   ;;  %v6089_v62 = vld [vmem:[%s8181_s3 + $0x20c] ss:$16 sps:$4 sm:$0xff]  }
 0x19b   :  { %v2890_v7 = vmax.f32 %v5406_v3, 0.0  ;;  %v6084_v63 = vld [vmem:[%s8181_s3 + $0x300] ss:$16 sps:$4 sm:$0xff]   ;;  %v6092_v0 = vld [vmem:[%s8181_s3 + $0x324] ss:$16 sps:$4 sm:$0xff]  }
 0x19c   :  { %v2891_v8 = vmax.f32 %v5408_v6, 0.0  ;;  %4282 = vmatpush1.bf16.msra.mxu0 %v6027_v2  ;;  %v6087_v51 = vld [vmem:[%s8181_s3 + $0x208] ss:$16 sps:$4 sm:$0xff]   ;;  %v6095_v2 = vld [vmem:[%s8181_s3 + $0x22c] ss:$16 sps:$4 sm:$0xff]  }
 0x19d   :  { %4283 = vmatprep.subr.bf16.mxu0 %v6035_v5  ;;  %v7599_v14 = vpack.c.bf16 %v2890_v7, %v2890_v7  ;;  %v6090_v3 = vld [vmem:[%s8181_s3 + $0x320] ss:$16 sps:$4 sm:$0xff]   ;;  %v6098_v4 = vld [vmem:[%s8181_s3 + $0x344] ss:$16 sps:$4 sm:$0xff]   ;;  %v6093_v5 = vld [vmem:[%s8181_s3 + $0x228] ss:$16 sps:$4 sm:$0xff]  }
 0x19e   :  { %v2898_v12 = vpack.c.bf16 %v2891_v8, %v2891_v8  ;;  %v6101_v6 = vld [vmem:[%s8181_s3 + $0x24c] ss:$16 sps:$4 sm:$0xff]   ;;  %v6096_v7 = vld [vmem:[%s8181_s3 + $0x340] ss:$16 sps:$4 sm:$0xff]   ;;  %v6104_v8 = vld [vmem:[%s8181_s3 + $0x364] ss:$16 sps:$4 sm:$0xff]  }
 0x1a0   :  { %4137 = vmatprep.mubr.bf16.mxu1 %v2898_v12  ;;  %4284 = vmatpush1.bf16.msra.mxu0 %v6033_v11  ;;  %v6099_v11 = vld [vmem:[%s8181_s3 + $0x248] ss:$16 sps:$4 sm:$0xff]  }
 0x1a1   :  { %4301 = vmatprep.mubr.bf16.mxu0 %v2898_v12  ;;  %4138 = vmatmul.mubr.bf16.vlgmr.msra.gmra.mrb[28].mxu1 %v7599_v14  ;;  %v6107_v12 = vld [vmem:[%s8181_s3 + $0x26c] ss:$16 sps:$4 sm:$0xff]  }
 0x1a2   :  { %4147 = vmatpush1.bf16.msra.mxu1 %v6036_v55  ;;  %4285 = vmatprep.subr.bf16.mxu0 %v6041_v13  ;;  %v6102_v55 = vld [vmem:[%s8181_s3 + $0x360] ss:$16 sps:$4 sm:$0xff]   ;;  %v6110_v13 = vld [vmem:[%s8181_s3 + $0x384] ss:$16 sps:$4 sm:$0xff]  }
 0x1a3   :  { %4148 = vmatprep.subr.bf16.mxu1 %v6044_v57  ;;  %v6113_v57 = vld [vmem:[%s8181_s3 + $0x28c] ss:$16 sps:$4 sm:$0xff]  }
 0x1a4   :  { %4286 = vmatpush1.bf16.msra.mxu0 %v6039_v15  ;;  %v6108_v15 = vld [vmem:[%s8181_s3 + $0x380] ss:$16 sps:$4 sm:$0xff]  }
 0x1a5   :  { %4287 = vmatprep.subr.bf16.mxu0 %v6047_v17  ;;  %v445_v17 = vsub.s32 2, %v7549_v10 }
 0x1a6   :  { %4149 = vmatpush1.bf16.msra.mxu1 %v6042_v19  ;;  %v6116_v19 = vld [vmem:[%s8181_s3 + $0x3a4] ss:$16 sps:$4 sm:$0xff]  }
 0x1a7   :  { %v7630_v26 = vpop.f32.mrb[4].mxu1  ;;  %4150 = vmatprep.subr.bf16.mxu1 %v6050_v20 }
 0x1a8   :  { %v2561_v28 = vpop.f32.mrb[5].mxu1  ;;  %4288 = vmatpush1.bf16.msra.mxu0 %v6045_v21  ;;  %v6111_v21 = vld [vmem:[%s8181_s3 + $0x288] ss:$16 sps:$4 sm:$0xff]  }
 0x1a9   :  { %v5410_v31 = vadd.f32 %v2561_v28, %v450_v22  ;;  %v2563_v32 = vpop.f32.mrb[6].mxu1  ;;  %4289 = vmatprep.subr.bf16.mxu0 %v6053_v23  ;;  %v6119_v23 = vld [vmem:[%s8181_s3 + $0x2ac] ss:$16 sps:$4 sm:$0xff]   ;;  %v6114_v28 = vld [vmem:[%s8181_s3 + $0x3a0] ss:$16 sps:$4 sm:$0xff]  }
 0x1aa   :  { %v2564_v34 = vpop.f32.mrb[7].mxu1  ;;  %4151 = vmatpush1.bf16.msra.mxu1 %v6048_v25  ;;  %v6122_v32 = vld [vmem:[%s8181_s3 + $0x3c4] ss:$16 sps:$4 sm:$0xff]  }
 0x1ab   :  { %v2893_v37 = vmax.f32 %v5410_v31, 0.0  ;;  %4152 = vmatprep.subr.bf16.mxu1 %v6056_v27  ;;  %v446_v31 = vrot.slane %v7564_v52, %v445_v17  ;;  %v6125_v34 = vld [vmem:[%s8181_s3 + $0x2cc] ss:$16 sps:$4 sm:$0xff]  }
 0x1ac   :  { %4290 = vmatpush1.bf16.msra.mxu0 %v6051_v30 }
 0x1ad   :  { %v2900_v40 = vpack.c.bf16 %v2893_v37, %v2893_v37  ;;  %4291 = vmatprep.subr.bf16.mxu0 %v6059_v33  ;;  %v6117_v33 = vld [vmem:[%s8181_s3 + $0x2a8] ss:$16 sps:$4 sm:$0xff]   ;;  %v5409_v37 = vadd.f32 %v7630_v26, %v446_v31  ;;  %v6126_v26 = vld [vmem:[%s8181_s3 + $0x3e0] ss:$16 sps:$4 sm:$0xff]   ;;  %v6206_v31 = vld [vmem:[%s8181_s3 + $0x504] ss:$16 sps:$4 sm:$0xff]  }
 0x1ae   :  { %4153 = vmatpush1.bf16.msra.mxu1 %v6054_v35  ;;  %v6120_v35 = vld [vmem:[%s8181_s3 + $0x3c0] ss:$16 sps:$4 sm:$0xff]  }
 0x1af   :  { %4178 = vmatprep.mubr.bf16.mxu1 %v2900_v40  ;;  %4154 = vmatprep.subr.bf16.mxu1 %v6062_v38  ;;  %v7659_v36 = vpop.f32.mrb[8].mxu1  ;;  %v6128_v38 = vld [vmem:[%s8181_s3 + $0x3e4] ss:$16 sps:$4 sm:$0xff]  }
 0x1b0   :  { %4292 = vmatpush1.bf16.msra.mxu0 %v6057_v39  ;;  %v7664_v44 = vpop.f32.mrb[9].mxu1  ;;  %v6123_v39 = vld [vmem:[%s8181_s3 + $0x2c8] ss:$16 sps:$4 sm:$0xff]  }
 0x1b1   :  { %4293 = vmatprep.subr.bf16.mxu0 %v6065_v41  ;;  %v2727_v18 = vpop.f32.mrb[10].mxu1  ;;  %v2892_v41 = vmax.f32 %v5409_v37, 0.0  ;;  %v6210_v37 = vld [vmem:[%s8181_s3 + $0x520] ss:$16 sps:$4 sm:$0xff]  }
 0x1b2   :  { %4155 = vmatpush1.bf16.msra.mxu1 %v6060_v42  ;;  %v2728_v47 = vpop.f32.mrb[11].mxu1  ;;  %v6158_v42 = vld [vmem:[%s8181_s3 + $0x404] ss:$16 sps:$4 sm:$0xff]  }
 0x1b3   :  { %4156 = vmatprep.subr.bf16.mxu1 %v6068_v9  ;;  %v6129_v9 = vld [vmem:[%s8181_s3 + $0x2e8] ss:$16 sps:$4 sm:$0xff]   ;;  %v7812_v18 = vpack.c.bf16 %v2892_v41, %v2892_v41  ;;  %v6224_v41 = vld [vmem:[%s8181_s3 + $0x564] ss:$16 sps:$4 sm:$0xff]  }
 0x1b4   :  { %4294 = vmatpush1.bf16.msra.mxu0 %v6063_v43  ;;  %v6134_v43 = vld [vmem:[%s8181_s3 + $0x30c] ss:$16 sps:$4 sm:$0xff]   ;;  %v6132_v47 = vld [vmem:[%s8181_s3 + $0x308] ss:$16 sps:$4 sm:$0xff]  }
 0x1b5   :  { %4295 = vmatprep.subr.bf16.mxu0 %v6071_v45  ;;  %v6156_v45 = vld [vmem:[%s8181_s3 + $0x400] ss:$16 sps:$4 sm:$0xff]  }
 0x1b6   :  { %4157 = vmatpush1.bf16.msra.mxu1 %v6066_v46  ;;  %v6164_v46 = vld [vmem:[%s8181_s3 + $0x424] ss:$16 sps:$4 sm:$0xff]  }
 0x1b7   :  { %4158 = vmatprep.subr.bf16.mxu1 %v6074_v29  ;;  %v6137_v29 = vld [vmem:[%s8181_s3 + $0x32c] ss:$16 sps:$4 sm:$0xff]  }
 0x1b8   :  { %4296 = vmatpush1.bf16.msra.mxu0 %v6069_v48  ;;  %v6162_v48 = vld [vmem:[%s8181_s3 + $0x420] ss:$16 sps:$4 sm:$0xff]  }
 0x1b9   :  { %4297 = vmatprep.subr.bf16.mxu0 %v6077_v24  ;;  %v6170_v24 = vld [vmem:[%s8181_s3 + $0x444] ss:$16 sps:$4 sm:$0xff]  }
 0x1ba   :  { %4159 = vmatpush1.bf16.msra.mxu1 %v6072_v50  ;;  %v6135_v50 = vld [vmem:[%s8181_s3 + $0x328] ss:$16 sps:$4 sm:$0xff]  }
 0x1bb   :  { %4160 = vmatprep.subr.bf16.mxu1 %v6080_v54  ;;  %v6140_v54 = vld [vmem:[%s8181_s3 + $0x34c] ss:$16 sps:$4 sm:$0xff]  }
 0x1bc   :  { %4298 = vmatpush1.bf16.msra.mxu0 %v6075_v56  ;;  %v6168_v56 = vld [vmem:[%s8181_s3 + $0x440] ss:$16 sps:$4 sm:$0xff]  }
 0x1bd   :  { %4299 = vmatprep.subr.bf16.mxu0 %v6083_v58  ;;  %v461_v58 = vsub.s32 6, %v7549_v10 }
 0x1be   :  { %4161 = vmatpush1.bf16.msra.mxu1 %v6078_v59  ;;  %v6176_v59 = vld [vmem:[%s8181_s3 + $0x464] ss:$16 sps:$4 sm:$0xff]  }
 0x1bf   :  { %4162 = vmatprep.subr.bf16.mxu1 %v6086_v60  ;;  %v6138_v60 = vld [vmem:[%s8181_s3 + $0x348] ss:$16 sps:$4 sm:$0xff]  }
 0x1c0   :  { %4300 = vmatpush1.bf16.msra.mxu0 %v6081_v61  ;;  %v6143_v61 = vld [vmem:[%s8181_s3 + $0x36c] ss:$16 sps:$4 sm:$0xff]  }
 0x1c1   :  { %4310 = vmatprep.subr.bf16.mxu0 %v6089_v62  ;;  %v6174_v62 = vld [vmem:[%s8181_s3 + $0x460] ss:$16 sps:$4 sm:$0xff]  }
 0x1c2   :  { %4163 = vmatpush1.bf16.msra.mxu1 %v6084_v63  ;;  %v462_v63 = vrot.slane %v7564_v52, %v461_v58  ;;  %v6191_v58 = vld [vmem:[%s8181_s3 + $0x4ac] ss:$16 sps:$4 sm:$0xff]  }
 0x1c3   :  { %4302 = vmatmul.mubr.bf16.vlgmr.msra.gmra.mrb[8].mxu0 %v7599_v14  ;;  %4164 = vmatprep.subr.bf16.mxu1 %v6092_v0  ;;  %v6105_v14 = vld [vmem:[%s8181_s3 + $0x268] ss:$16 sps:$4 sm:$0xff]   ;;  %v6182_v0 = vld [vmem:[%s8181_s3 + $0x484] ss:$16 sps:$4 sm:$0xff]  }
 0x1c4   :  { %4311 = vmatpush1.bf16.msra.mxu0 %v6087_v51  ;;  %4342 = vmatprep.mubr.bf16.mxu0 %v2900_v40  ;;  %v6131_v40 = vld [vmem:[%s8181_s3 + $0x2ec] ss:$16 sps:$4 sm:$0xff]   ;;  %v6141_v51 = vld [vmem:[%s8181_s3 + $0x368] ss:$16 sps:$4 sm:$0xff]  }
 0x1c5   :  { %4312 = vmatprep.subr.bf16.mxu0 %v6095_v2  ;;  %v6146_v2 = vld [vmem:[%s8181_s3 + $0x38c] ss:$16 sps:$4 sm:$0xff]  }
 0x1c6   :  { %4165 = vmatpush1.bf16.msra.mxu1 %v6090_v3  ;;  %v6180_v3 = vld [vmem:[%s8181_s3 + $0x480] ss:$16 sps:$4 sm:$0xff]  }
 0x1c7   :  { %4166 = vmatprep.subr.bf16.mxu1 %v6098_v4  ;;  %v6144_v4 = vld [vmem:[%s8181_s3 + $0x388] ss:$16 sps:$4 sm:$0xff]  }
 0x1c8   :  { %4313 = vmatpush1.bf16.msra.mxu0 %v6093_v5  ;;  %v6188_v5 = vld [vmem:[%s8181_s3 + $0x4a4] ss:$16 sps:$4 sm:$0xff]  }
 0x1c9   :  { %4314 = vmatprep.subr.bf16.mxu0 %v6101_v6  ;;  %v6149_v6 = vld [vmem:[%s8181_s3 + $0x3ac] ss:$16 sps:$4 sm:$0xff]  }
 0x1ca   :  { %4167 = vmatpush1.bf16.msra.mxu1 %v6096_v7 }
 0x1cb   :  { %4168 = vmatprep.subr.bf16.mxu1 %v6104_v8 }
 0x1cc   :  { %4315 = vmatpush1.bf16.msra.mxu0 %v6099_v11 }
 0x1cd   :  { %4316 = vmatprep.subr.bf16.mxu0 %v6107_v12  ;;  %v6186_v12 = vld [vmem:[%s8181_s3 + $0x4a0] ss:$16 sps:$4 sm:$0xff]  }
 0x1ce   :  { %4169 = vmatpush1.bf16.msra.mxu1 %v6102_v55 }
 0x1cf   :  { %4170 = vmatprep.subr.bf16.mxu1 %v6110_v13  ;;  %v5325_v20 = vpop.f32.mrb[12].mxu1 }
 0x1d0   :  { %4317 = vmatpush1.bf16.msra.mxu0 %v6105_v14  ;;  %v5326_v22 = vpop.f32.mrb[13].mxu1  ;;  %v6147_v14 = vld [vmem:[%s8181_s3 + $0x3a8] ss:$16 sps:$4 sm:$0xff]  }
 0x1d1   :  { %4318 = vmatprep.subr.bf16.mxu0 %v6113_v57  ;;  %v7767_v25 = vadd.f32 %v5326_v22, %v5325_v20  ;;  %v5328_v27 = vpop.f32.mrb[14].mxu1  ;;  %v6194_v20 = vld [vmem:[%s8181_s3 + $0x4c4] ss:$16 sps:$4 sm:$0xff]   ;;  %v6192_v22 = vld [vmem:[%s8181_s3 + $0x4c0] ss:$16 sps:$4 sm:$0xff]  }
 0x1d2   :  { %4171 = vmatpush1.bf16.msra.mxu1 %v6108_v15  ;;  %v5329_v30 = vpop.f32.mrb[15].mxu1  ;;  %v6152_v15 = vld [vmem:[%s8181_s3 + $0x3cc] ss:$16 sps:$4 sm:$0xff]   ;;  %v6153_v27 = vld [vmem:[%s8181_s3 + $0x3e8] ss:$16 sps:$4 sm:$0xff]  }
 0x1d3   :  { %4172 = vmatprep.subr.bf16.mxu1 %v6116_v19  ;;  %v2765_v7 = vadd.f32 %v7767_v25, %v462_v63  ;;  %v6200_v25 = vld [vmem:[%s8181_s3 + $0x4e4] ss:$16 sps:$4 sm:$0xff]   ;;  %v6161_v30 = vld [vmem:[%s8181_s3 + $0x40c] ss:$16 sps:$4 sm:$0xff]   ;;  %v6189_v63 = vld [vmem:[%s8181_s3 + $0x4a8] ss:$16 sps:$4 sm:$0xff]  }
 0x1d4   :  { %4319 = vmatpush1.bf16.msra.mxu0 %v6111_v21  ;;  %v6150_v21 = vld [vmem:[%s8181_s3 + $0x3c8] ss:$16 sps:$4 sm:$0xff]  }
 0x1d5   :  { %4320 = vmatprep.subr.bf16.mxu0 %v6119_v23  ;;  %v6155_v23 = vld [vmem:[%s8181_s3 + $0x3ec] ss:$16 sps:$4 sm:$0xff]  }
 0x1d6   :  { %4173 = vmatpush1.bf16.msra.mxu1 %v6114_v28  ;;  %v6198_v28 = vld [vmem:[%s8181_s3 + $0x4e0] ss:$16 sps:$4 sm:$0xff]  }
 0x1d7   :  { %4174 = vmatprep.subr.bf16.mxu1 %v6122_v32  ;;  %v6159_v32 = vld [vmem:[%s8181_s3 + $0x408] ss:$16 sps:$4 sm:$0xff]  }
 0x1d8   :  { %4321 = vmatpush1.bf16.msra.mxu0 %v6117_v33  ;;  %v6204_v33 = vld [vmem:[%s8181_s3 + $0x500] ss:$16 sps:$4 sm:$0xff]  }
 0x1d9   :  { %4322 = vmatprep.subr.bf16.mxu0 %v6125_v34  ;;  %v6167_v34 = vld [vmem:[%s8181_s3 + $0x42c] ss:$16 sps:$4 sm:$0xff]  }
 0x1da   :  { %4175 = vmatpush1.bf16.msra.mxu1 %v6120_v35  ;;  %v6212_v35 = vld [vmem:[%s8181_s3 + $0x524] ss:$16 sps:$4 sm:$0xff]  }
 0x1db   :  { %4176 = vmatprep.subr.bf16.mxu1 %v6128_v38  ;;  %v6218_v38 = vld [vmem:[%s8181_s3 + $0x544] ss:$16 sps:$4 sm:$0xff]  }
 0x1dc   :  { %4323 = vmatpush1.bf16.msra.mxu0 %v6123_v39  ;;  %v6165_v39 = vld [vmem:[%s8181_s3 + $0x428] ss:$16 sps:$4 sm:$0xff]  }
 0x1dd   :  { %4324 = vmatprep.subr.bf16.mxu0 %v6131_v40  ;;  %v6173_v40 = vld [vmem:[%s8181_s3 + $0x44c] ss:$16 sps:$4 sm:$0xff]  }
 0x1de   :  { %4177 = vmatpush1.bf16.msra.mxu1 %v6126_v26  ;;  %v6216_v26 = vld [vmem:[%s8181_s3 + $0x540] ss:$16 sps:$4 sm:$0xff]  }
 0x1df   :  { %4187 = vmatprep.subr.bf16.mxu1 %v6158_v42  ;;  %v6171_v42 = vld [vmem:[%s8181_s3 + $0x448] ss:$16 sps:$4 sm:$0xff]  }
 0x1e0   :  { %4325 = vmatpush1.bf16.msra.mxu0 %v6129_v9  ;;  %v6179_v9 = vld [vmem:[%s8181_s3 + $0x46c] ss:$16 sps:$4 sm:$0xff]  }
 0x1e1   :  { %4179 = vmatmul.mubr.bf16.vlgmr.msra.gmra.mrb[28].mxu1 %v7812_v18  ;;  %4326 = vmatprep.subr.bf16.mxu0 %v6134_v43  ;;  %v6222_v43 = vld [vmem:[%s8181_s3 + $0x560] ss:$16 sps:$4 sm:$0xff]  }
 0x1e2   :  { %4188 = vmatpush1.bf16.msra.mxu1 %v6156_v45  ;;  %v6230_v45 = vld [vmem:[%s8181_s3 + $0x584] ss:$16 sps:$4 sm:$0xff]  }
 0x1e3   :  { %4189 = vmatprep.subr.bf16.mxu1 %v6164_v46  ;;  %v6185_v46 = vld [vmem:[%s8181_s3 + $0x48c] ss:$16 sps:$4 sm:$0xff]  }
 0x1e4   :  { %4327 = vmatpush1.bf16.msra.mxu0 %v6132_v47  ;;  %v6228_v47 = vld [vmem:[%s8181_s3 + $0x580] ss:$16 sps:$4 sm:$0xff]  }
 0x1e5   :  { %4328 = vmatprep.subr.bf16.mxu0 %v6137_v29 }
 0x1e6   :  { %4190 = vmatpush1.bf16.msra.mxu1 %v6162_v48  ;;  %v6236_v48 = vld [vmem:[%s8181_s3 + $0x5a4] ss:$16 sps:$4 sm:$0xff]  }
 0x1e7   :  { %4191 = vmatprep.subr.bf16.mxu1 %v6170_v24 }
 0x1e8   :  { %4329 = vmatpush1.bf16.msra.mxu0 %v6135_v50  ;;  %v6183_v50 = vld [vmem:[%s8181_s3 + $0x488] ss:$16 sps:$4 sm:$0xff]  }
 0x1e9   :  { %4330 = vmatprep.subr.bf16.mxu0 %v6140_v54 }
 0x1ea   :  { %4192 = vmatpush1.bf16.msra.mxu1 %v6168_v56 }
 0x1eb   :  { %4193 = vmatprep.subr.bf16.mxu1 %v6176_v59 }
 0x1ec   :  { %4331 = vmatpush1.bf16.msra.mxu0 %v6138_v60  ;;  %v6234_v60 = vld [vmem:[%s8181_s3 + $0x5a0] ss:$16 sps:$4 sm:$0xff]  }
 0x1ed   :  { %4332 = vmatprep.subr.bf16.mxu0 %v6143_v61 }
 0x1ee   :  { %4194 = vmatpush1.bf16.msra.mxu1 %v6174_v62  ;;  %v6242_v62 = vld [vmem:[%s8181_s3 + $0x5c4] ss:$16 sps:$4 sm:$0xff]  }
 0x1ef   :  { %v5347_v8 = vpop.f32.mrb[16].mxu1  ;;  %4195 = vmatprep.subr.bf16.mxu1 %v6182_v0  ;;  %v6197_v0 = vld [vmem:[%s8181_s3 + $0x4cc] ss:$16 sps:$4 sm:$0xff]  }
 0x1f0   :  { %4333 = vmatpush1.bf16.msra.mxu0 %v6141_v51  ;;  %v5348_v11 = vpop.f32.mrb[17].mxu1  ;;  %v6240_v51 = vld [vmem:[%s8181_s3 + $0x5c0] ss:$16 sps:$4 sm:$0xff]  }
 0x1f1   :  { %4334 = vmatprep.subr.bf16.mxu0 %v6146_v2  ;;  %v5349_v55 = vadd.f32 %v5348_v11, %v5347_v8  ;;  %v5350_v13 = vpop.f32.mrb[18].mxu1  ;;  %v6246_v11 = vld [vmem:[%s8181_s3 + $0x5e0] ss:$16 sps:$4 sm:$0xff]  }
 0x1f2   :  { %v5351_v57 = vpop.f32.mrb[19].mxu1  ;;  %4196 = vmatpush1.bf16.msra.mxu1 %v6180_v3  ;;  %v6248_v3 = vld [vmem:[%s8181_s3 + $0x5e4] ss:$16 sps:$4 sm:$0xff]   ;;  %v6201_v13 = vld [vmem:[%s8181_s3 + $0x4e8] ss:$16 sps:$4 sm:$0xff]  }
 0x1f3   :  { %v7884_v19 = vadd.f32 %v5349_v55, %v2765_v7  ;;  %4197 = vmatprep.subr.bf16.mxu1 %v6188_v5  ;;  %v6195_v5 = vld [vmem:[%s8181_s3 + $0x4c8] ss:$16 sps:$4 sm:$0xff]   ;;  %v6203_v7 = vld [vmem:[%s8181_s3 + $0x4ec] ss:$16 sps:$4 sm:$0xff]   ;;  %v6254_v55 = vld [vmem:[%s8181_s3 + $0x604] ss:$16 sps:$4 sm:$0xff]  }
 0x1f4   :  { %4335 = vmatpush1.bf16.msra.mxu0 %v6144_v4  ;;  %v6207_v57 = vld [vmem:[%s8181_s3 + $0x508] ss:$16 sps:$4 sm:$0xff]  }
 0x1f5   :  { %4336 = vmatprep.subr.bf16.mxu0 %v6149_v6 }
 0x1f6   :  { %4198 = vmatpush1.bf16.msra.mxu1 %v6186_v12 }
 0x1f7   :  { %4199 = vmatprep.subr.bf16.mxu1 %v6194_v20  ;;  %v6221_v20 = vld [vmem:[%s8181_s3 + $0x54c] ss:$16 sps:$4 sm:$0xff]  }
 0x1f8   :  { %4337 = vmatpush1.bf16.msra.mxu0 %v6147_v14  ;;  %v6209_v14 = vld [vmem:[%s8181_s3 + $0x50c] ss:$16 sps:$4 sm:$0xff]  }
 0x1f9   :  { %4338 = vmatprep.subr.bf16.mxu0 %v6152_v15  ;;  %v6215_v15 = vld [vmem:[%s8181_s3 + $0x52c] ss:$16 sps:$4 sm:$0xff]  }
 0x1fa   :  { %4200 = vmatpush1.bf16.msra.mxu1 %v6192_v22  ;;  %v6227_v22 = vld [vmem:[%s8181_s3 + $0x56c] ss:$16 sps:$4 sm:$0xff]  }
 0x1fb   :  { %4201 = vmatprep.subr.bf16.mxu1 %v6200_v25  ;;  %v6233_v25 = vld [vmem:[%s8181_s3 + $0x58c] ss:$16 sps:$4 sm:$0xff]  }
 0x1fc   :  { %4339 = vmatpush1.bf16.msra.mxu0 %v6150_v21  ;;  %v6219_v21 = vld [vmem:[%s8181_s3 + $0x548] ss:$16 sps:$4 sm:$0xff]  }
 0x1fd   :  { %4340 = vmatprep.subr.bf16.mxu0 %v6155_v23  ;;  %v6225_v23 = vld [vmem:[%s8181_s3 + $0x568] ss:$16 sps:$4 sm:$0xff]  }
 0x1fe   :  { %4202 = vmatpush1.bf16.msra.mxu1 %v6198_v28  ;;  %v6239_v28 = vld [vmem:[%s8181_s3 + $0x5ac] ss:$16 sps:$4 sm:$0xff]  }
 0x1ff   :  { %4203 = vmatprep.subr.bf16.mxu1 %v6206_v31  ;;  %v6245_v31 = vld [vmem:[%s8181_s3 + $0x5cc] ss:$16 sps:$4 sm:$0xff]  }
 0x200   :  { %4341 = vmatpush1.bf16.msra.mxu0 %v6153_v27  ;;  %v6231_v27 = vld [vmem:[%s8181_s3 + $0x588] ss:$16 sps:$4 sm:$0xff]  }
 0x201   :  { %4351 = vmatprep.subr.bf16.mxu0 %v6161_v30  ;;  %v6237_v30 = vld [vmem:[%s8181_s3 + $0x5a8] ss:$16 sps:$4 sm:$0xff]  }
 0x202   :  { %4204 = vmatpush1.bf16.msra.mxu1 %v6204_v33  ;;  %v6251_v33 = vld [vmem:[%s8181_s3 + $0x5ec] ss:$16 sps:$4 sm:$0xff]  }
 0x203   :  { %4343 = vmatmul.mubr.bf16.vlgmr.msra.gmra.mrb[8].mxu0 %v7812_v18  ;;  %4205 = vmatprep.subr.bf16.mxu1 %v6212_v35  ;;  %v6177_v18 = vld [vmem:[%s8181_s3 + $0x468] ss:$16 sps:$4 sm:$0xff]   ;;  %v6257_v35 = vld [vmem:[%s8181_s3 + $0x60c] ss:$16 sps:$4 sm:$0xff]  }
 0x204   :  { %4352 = vmatpush1.bf16.msra.mxu0 %v6159_v32  ;;  %v6243_v32 = vld [vmem:[%s8181_s3 + $0x5c8] ss:$16 sps:$4 sm:$0xff]  }
 0x205   :  { %4353 = vmatprep.subr.bf16.mxu0 %v6167_v34  ;;  %v6249_v34 = vld [vmem:[%s8181_s3 + $0x5e8] ss:$16 sps:$4 sm:$0xff]  }
 0x206   :  { %4206 = vmatpush1.bf16.msra.mxu1 %v6210_v37  ;;  %v453_v37 = vsub.s32 4, %v7549_v10 }
 0x207   :  { %4207 = vmatprep.subr.bf16.mxu1 %v6218_v38  ;;  %v457_v38 = vsub.s32 5, %v7549_v10 }
 0x208   :  { %4354 = vmatpush1.bf16.msra.mxu0 %v6165_v39  ;;  %v454_v39 = vrot.slane %v7564_v52, %v453_v37  ;;  %v6278_v37 = vld [vmem:[%s8183_s5 + $0xa0] sm:$0xff]  }
 0x209   :  { %4355 = vmatprep.subr.bf16.mxu0 %v6173_v40  ;;  %v458_v40 = vrot.slane %v7564_v52, %v457_v38  ;;  %v6255_v52 = vld [vmem:[%s8181_s3 + $0x608] ss:$16 sps:$4 sm:$0xff]  }
 0x20a   :  { %4208 = vmatpush1.bf16.msra.mxu1 %v6216_v26  ;;  %v6279_v38 = vld [vmem:[%s8183_s5 + $0xa8] sm:$0xff]  }
 0x20b   :  { %4209 = vmatprep.subr.bf16.mxu1 %v6224_v41 }
 0x20c   :  { %4356 = vmatpush1.bf16.msra.mxu0 %v6171_v42 }
 0x20d   :  { %4357 = vmatprep.subr.bf16.mxu0 %v6179_v9 }
 0x20e   :  { %4210 = vmatpush1.bf16.msra.mxu1 %v6222_v43 }
 0x20f   :  { %v5369_v29 = vpop.f32.mrb[20].mxu1  ;;  %4211 = vmatprep.subr.bf16.mxu1 %v6230_v45 }
 0x210   :  { %v5370_v24 = vpop.f32.mrb[21].mxu1  ;;  %4358 = vmatpush1.bf16.msra.mxu0 %v6177_v18 }
 0x211   :  { %v5371_v54 = vadd.f32 %v5370_v24, %v5369_v29  ;;  %v5372_v56 = vpop.f32.mrb[22].mxu1  ;;  %4359 = vmatprep.subr.bf16.mxu0 %v6185_v46  ;;  %v6252_v24 = vld [vmem:[%s8181_s3 + $0x600] ss:$16 sps:$4 sm:$0xff]  }
 0x212   :  { %v5373_v59 = vpop.f32.mrb[23].mxu1  ;;  %4212 = vmatpush1.bf16.msra.mxu1 %v6228_v47 }
 0x213   :  { %v2845_v61 = vadd.f32 %v5371_v54, %v7884_v19  ;;  %4213 = vmatprep.subr.bf16.mxu1 %v6236_v48  ;;  %v6213_v19 = vld [vmem:[%s8181_s3 + $0x528] ss:$16 sps:$4 sm:$0xff]   ;;  %v6259_v54 = vld [vmem:[%s8183_s5] sm:$0xff]  }
 0x214   :  { %4360 = vmatpush1.bf16.msra.mxu0 %v6183_v50  ;;  %v6261_v59 = vld [vmem:[%s8183_s5 + $0x8] sm:$0xff]  }
 0x215   :  { %4361 = vmatprep.subr.bf16.mxu0 %v6191_v58  ;;  %v6260_v58 = vld [vmem:[%s8183_s5 + $0x48] sm:$0xff]  }
 0x216   :  { %4214 = vmatpush1.bf16.msra.mxu1 %v6234_v60  ;;  %v6262_v60 = vld [vmem:[%s8183_s5 + $0x50] sm:$0xff]  }
 0x217   :  { %v2884_v2 = vpop.f32.mrb[24].mxu1  ;;  %4215 = vmatprep.subr.bf16.mxu1 %v6242_v62  ;;  %v6264_v62 = vld [vmem:[%s8183_s5 + $0x58] sm:$0xff]  }
 0x218   :  { %v7993_v4 = vadd.f32 %v2884_v2, %v2845_v61  ;;  %4362 = vmatpush1.bf16.msra.mxu0 %v6189_v63  ;;  %v5403_v6 = vpop.f32.mrb[25].mxu1  ;;  %v6263_v61 = vld [vmem:[%s8183_s5 + $0x10] sm:$0xff]   ;;  %v6265_v63 = vld [vmem:[%s8183_s5 + $0x18] sm:$0xff]   ;;  %v6268_v2 = vld [vmem:[%s8183_s5 + $0x68] sm:$0xff]  }
 0x219   :  { %4363 = vmatprep.subr.bf16.mxu0 %v6197_v0  ;;  %v2887_v8 = vpop.f32.mrb[26].mxu1  ;;  %v6266_v0 = vld [vmem:[%s8183_s5 + $0x60] sm:$0xff]   ;;  %v6272_v6 = vld [vmem:[%s8183_s5 + $0x78] sm:$0xff]  }
 0x21a   :  { %4216 = vmatpush1.bf16.msra.mxu1 %v6240_v51  ;;  %v5404_v12 = vpop.f32.mrb[27].mxu1  ;;  %v6267_v51 = vld [vmem:[%s8183_s5 + $0x20] sm:$0xff]  }
 0x21b   :  { %4217 = vmatprep.subr.bf16.mxu1 %v6248_v3  ;;  %v6269_v3 = vld [vmem:[%s8183_s5 + $0x28] sm:$0xff]   ;;  %v3100_v8 = vld [vmem:[%s8184_s4] sm:$0xf] }
 0x21c   :  { %4364 = vmatpush1.bf16.msra.mxu0 %v6195_v5  ;;  %v6271_v5 = vld [vmem:[%s8183_s5 + $0x30] sm:$0xff]   ;;  %v3109_v12 = vrot.slane %v3100_v8, %v441_v53  ;;  %v6274_v53 = vld [vmem:[%s8183_s5 + $0x80] sm:$0xff]  }
 0x21d   :  { %4365 = vmatprep.subr.bf16.mxu0 %v6203_v7  ;;  %v6273_v7 = vld [vmem:[%s8183_s5 + $0x38] sm:$0xff]  }
 0x21e   :  { %4218 = vmatpush1.bf16.msra.mxu1 %v6246_v11  ;;  %v3105_v11 = vrot.slane %v3100_v8, %v437_v49 }
 0x21f   :  { %4228 = vmatprep.subr.bf16.mxu1 %v6254_v55  ;;  %v3117_v55 = vrot.slane %v3100_v8, %v449_v16 }
 0x220   :  { %4366 = vmatpush1.bf16.msra.mxu0 %v6201_v13 }
 0x221   :  { %4367 = vmatprep.subr.bf16.mxu0 %v6209_v14 }
 0x224   :  { %4368 = vmatpush1.bf16.msra.mxu0 %v6207_v57 }
 0x225   :  { %4369 = vmatprep.subr.bf16.mxu0 %v6215_v15 }
 0x228   :  { %4370 = vmatpush1.bf16.msra.mxu0 %v6213_v19 }
 0x229   :  { %4371 = vmatprep.subr.bf16.mxu0 %v6221_v20 }
 0x22c   :  { %4372 = vmatpush1.bf16.msra.mxu0 %v6219_v21 }
 0x22d   :  { %4373 = vmatprep.subr.bf16.mxu0 %v6227_v22 }
 0x230   :  { %4374 = vmatpush1.bf16.msra.mxu0 %v6225_v23 }
 0x231   :  { %4375 = vmatprep.subr.bf16.mxu0 %v6233_v25 }
 0x234   :  { %4376 = vmatpush1.bf16.msra.mxu0 %v6231_v27 }
 0x235   :  { %4377 = vmatprep.subr.bf16.mxu0 %v6239_v28 }
 0x238   :  { %4378 = vmatpush1.bf16.msra.mxu0 %v6237_v30 }
 0x239   :  { %4379 = vmatprep.subr.bf16.mxu0 %v6245_v31 }
 0x23c   :  { %4380 = vmatpush1.bf16.msra.mxu0 %v6243_v32 }
 0x23d   :  { %4381 = vmatprep.subr.bf16.mxu0 %v6251_v33  ;;  %v6275_v33 = vld [vmem:[%s8183_s5 + $0x88] sm:$0xff]  }
 0x240   :  { %4382 = vmatpush1.bf16.msra.mxu0 %v6249_v34  ;;  %v6276_v34 = vld [vmem:[%s8183_s5 + $0x90] sm:$0xff]  }
 0x241   :  { %4392 = vmatprep.subr.bf16.mxu0 %v6257_v35  ;;  %v6277_v35 = vld [vmem:[%s8183_s5 + $0x98] sm:$0xff]  }
 0x256   :  { %v2682_v26 = vpop.f32.mrb[4].mxu0 }
 0x257   :  { %v5411_v41 = vadd.f32 %v2682_v26, %v454_v39  ;;  %v2684_v42 = vpop.f32.mrb[5].mxu0  ;;  %v6280_v39 = vld [vmem:[%s8183_s5 + $0xb0] sm:$0xff]   ;;  %v6281_v26 = vld [vmem:[%s8183_s5 + $0xb8] sm:$0xff]  }
 0x258   :  { %v5413_v9 = vadd.f32 %v2684_v42, %v458_v40  ;;  %v2686_v43 = vpop.f32.mrb[6].mxu0  ;;  %v3113_v40 = vrot.slane %v3100_v8, %v445_v17  ;;  %v6282_v42 = vld [vmem:[%s8183_s5 + $0xc0] ss:$0 sps:$4 sm:$0xff]  }
 0x259   :  { %v5412_v45 = vadd.f32 %v5411_v41, %v7659_v36  ;;  %v2687_v18 = vpop.f32.mrb[7].mxu0  ;;  %v6258_v36 = vld [vmem:[%s8183_s5 + $0x40] sm:$0xff]   ;;  %v4650_v10 = vsel %vm4648_vm3, %v6282_v42, 0 }
 0x25a   :  { %v5414_v46 = vadd.f32 %v5413_v9, %v7664_v44  ;;  %v2896_v44 = vmax.f32 %v7993_v4, 0.0  ;;  %v6270_v4 = vld [vmem:[%s8183_s5 + $0x70] sm:$0xff]  }
 0x25b   :  { %v2894_v47 = vmax.f32 %v5412_v45, 0.0 }
 0x25c   :  { %v2895_v29 = vmax.f32 %v5414_v46, 0.0  ;;  %v2903_v56 = vpack.c.bf16 %v2896_v44, %v2896_v44 }
 0x25d   :  { %v2901_v50 = vpack.c.bf16 %v2894_v47, %v2894_v47 }
 0x25e   :  { %v2902_v48 = vpack.c.bf16 %v2895_v29, %v2895_v29  ;;  %v5282_v29 = vld [vmem:[%s8185_s6] ss:$0 sm:$0xff] }
 0x260   :  { %4219 = vmatprep.mubr.bf16.mxu1 %v2902_v48  ;;  %4383 = vmatprep.mubr.bf16.mxu0 %v2902_v48 }
 0x261   :  { %4220 = vmatmul.mubr.bf16.vlgmr.msra.gmra.mrb[28].mxu1 %v2901_v50  ;;  %4384 = vmatmul.mubr.bf16.vlgmr.msra.gmra.mrb[8].mxu0 %v2901_v50 }
 0x262   :  { %4229 = vmatpush1.bf16.msra.mxu1 %v6252_v24  ;;  %4393 = vmatpush1.bf16.msra.mxu0 %v6255_v52 }
 0x263   :  { %4260 = vmatprep.mubr.bf16.mxu1 %v6283_v1  ;;  %4424 = vmatprep.mubr.bf16.mxu0 %v6283_v1 }
 0x264   :  { %5377 = vmatprep.subr.bf16.mxu1 %v6258_v36 }
 0x26d   :  { %5280 = vmatmul.mubr.msk.bf16.vlgmr.msra.gmra.mrb[28].mxu1 %vm2234_vm0, %v2903_v56  ;;  %5281 = vmatmul.mubr.msk.bf16.vlgmr.msra.gmra.mrb[8].mxu0 %vm2234_vm0, %v2903_v56 }
 0x26e   :  { %5378 = vmatpush3.bf16.msra.mxu1 %v6259_v54 }
 0x26f   :  { %5379 = vmatprep.subr.bf16.mxu1 %v6260_v58 }
 0x272   :  { %5380 = vmatpush3.bf16.msra.mxu1 %v6261_v59 }
 0x273   :  { %5381 = vmatprep.subr.bf16.mxu1 %v6262_v60 }
 0x276   :  { %5382 = vmatpush3.bf16.msra.mxu1 %v6263_v61 }
 0x277   :  { %5383 = vmatprep.subr.bf16.mxu1 %v6264_v62 }
 0x27a   :  { %5384 = vmatpush3.bf16.msra.mxu1 %v6265_v63 }
 0x27b   :  { %5385 = vmatprep.subr.bf16.mxu1 %v6266_v0 }
 0x27e   :  { %5386 = vmatpush3.bf16.msra.mxu1 %v6267_v51 }
 0x27f   :  { %5387 = vmatprep.subr.bf16.mxu1 %v6268_v2 }
 0x282   :  { %5388 = vmatpush3.bf16.msra.mxu1 %v6269_v3 }
 0x283   :  { %5389 = vmatprep.subr.bf16.mxu1 %v6270_v4 }
 0x286   :  { %5390 = vmatpush3.bf16.msra.mxu1 %v6271_v5 }
 0x287   :  { %5391 = vmatprep.subr.bf16.mxu1 %v6272_v6 }
 0x28a   :  { %5392 = vmatpush3.bf16.msra.mxu1 %v6273_v7 }
 0x28b   :  { %4692 = vmatprep.subr.bf16.mxu1 %v6283_v1 }
 0x340   :  { %v4262_v13 = vpop.f32.mrb[28].mxu1  ;;  %v4426_v14 = vpop.f32.mrb[8].mxu0 }
 0x341   :  { %v5415_v57 = vadd.f32 %v4262_v13, %v3105_v11  ;;  %v4264_v15 = vpop.f32.mrb[29].mxu1  ;;  %v4428_v19 = vpop.f32.mrb[9].mxu0  ;;  %v5417_v41 = vadd.f32 %v4426_v14, %v3113_v40 }
 0x342   :  { %v5416_v20 = vadd.f32 %v4264_v15, %v3109_v12  ;;  %v5418_v21 = vadd.f32 %v4428_v19, %v3117_v55  ;;  %v4266_v22 = vpop.f32.mrb[30].mxu1  ;;  %v4430_v23 = vpop.f32.mrb[10].mxu0 }
 0x343   :  { %v4433_v25 = vmax.f32 %v5415_v57, 0.0  ;;  %v4267_v27 = vpop.f32.mrb[31].mxu1  ;;  %v4431_v28 = vpop.f32.mrb[11].mxu0  ;;  %v4435_v9 = vmax.f32 %v5417_v41, 0.0 }
 0x344   :  { %v4434_v30 = vmax.f32 %v5416_v20, 0.0  ;;  %v4436_v49 = vmax.f32 %v5418_v21, 0.0 }
 0x345   :  { %v4437_v16 = vpack.c.bf16 %v4433_v25, %v4433_v25  ;;  %v4439_v17 = vpack.c.bf16 %v4435_v9, %v4435_v9 }
 0x346   :  { %v4438_v31 = vpack.c.bf16 %v4434_v30, %v4434_v30  ;;  %v4440_v32 = vpack.c.bf16 %v4436_v49, %v4436_v49 }
 0x348   :  { %4684 = vmatprep.mubr.bf16.mxu1 %v4438_v31 }
 0x349   :  { %4685 = vmatmul.mubr.bf16.vlgmr.msra.gmra.mrb[32].mxu1 %v4437_v16 }
 0x34a   :  { %4693 = vmatpush1.bf16.msra.mxu1 %v6274_v53  ;;  %5308 = vmatprep.mubr.msk.bf16.mxu1 %vm4644_vm2, %v4440_v32 }
 0x34b   :  { %4694 = vmatprep.subr.bf16.mxu1 %v6283_v1 }
 0x34e   :  { %4695 = vmatpush1.bf16.msra.mxu1 %v6275_v33 }
 0x34f   :  { %4696 = vmatprep.subr.bf16.mxu1 %v6283_v1 }
 0x352   :  { %4697 = vmatpush1.bf16.msra.mxu1 %v6276_v34 }
 0x353   :  { %4698 = vmatprep.subr.bf16.mxu1 %v6283_v1 }
 0x356   :  { %4699 = vmatpush1.bf16.msra.mxu1 %v6277_v35 }
 0x357   :  { %4700 = vmatprep.subr.bf16.mxu1 %v6283_v1 }
 0x35a   :  { %4701 = vmatpush1.bf16.msra.mxu1 %v6278_v37 }
 0x35b   :  { %4702 = vmatprep.subr.bf16.mxu1 %v6283_v1 }
 0x35e   :  { %4703 = vmatpush1.bf16.msra.mxu1 %v6279_v38 }
 0x35f   :  { %4704 = vmatprep.subr.bf16.mxu1 %v6283_v1 }
 0x362   :  { %4705 = vmatpush1.bf16.msra.mxu1 %v6280_v39 }
 0x363   :  { %4706 = vmatprep.subr.bf16.mxu1 %v6283_v1 }
 0x366   :  { %4707 = vmatpush1.bf16.msra.mxu1 %v6281_v26 }
 0x367   :  { %4708 = vmatprep.subr.bf16.mxu1 %v6283_v1 }
 0x36a   :  { %4709 = vmatpush1.bf16.msra.mxu1 %v4650_v10 }
 0x36d   :  { %4725 = vmatmul.mubr.bf16.vlgmr.msra.gmra.mrb[36].mxu1 %v4439_v17 }
 0x41c   :  { %v5393_v43 = vpop.f32.mrb[32].mxu1 }
 0x41d   :  { %v5394_v45 = vpop.f32.mrb[33].mxu1 }
 0x41e   :  { %v5395_v18 = vadd.f32 %v5394_v45, %v5393_v43  ;;  %v5396_v46 = vpop.f32.mrb[34].mxu1 }
 0x41f   :  { %v5397_v47 = vpop.f32.mrb[35].mxu1 }
 0x420   :  { %v4687_v48 = vadd.f32 %v5395_v18, %v5282_v29 }
 0x440   :  { %v4726_v24 = vpop.f32.mrb[36].mxu1 }
 0x441   :  { %v4727_v52 = vadd.f32 %v4726_v24, %v4687_v48  ;;  %v4728_v50 = vpop.f32.mrb[37].mxu1 }
 0x442   :  { %v4729_v36 = vpop.f32.mrb[38].mxu1 }
 0x443   :  { %4732 = vst [vmem:[%s8186_s7] sm:$0xff] %v4727_v52  ;;  %v4730_v1 = vpop.f32.mrb[39].mxu1 }

</bundles_post_ra>
